<compile_context>
chip_gen: v6e
topology: v6e:2x2x1
jax: 0.10.0
libtpu: 0.0.40
codegen_flags: <defaults>
</compile_context>

<pallas_src>
import jax
import jax.numpy as jnp
from jax import lax
from jax.experimental import pallas as pl
from jax.experimental.pallas import tpu as pltpu

# ---- "constant" module values (synthetic, small) ----------------------------
ENCODER_HIDDEN_SIZE = 16      # GRU input size
PREDICTOR_HIDDEN_SIZE = 32    # GRU hidden size
PREDICTOR_LAYERS = 2          # GRU layers (wavefront kernel is specialized to 2)
PREDICTOR_MIXTURES = 4        # number of vMF mixtures

_SUBLANES_F32 = 8             # f32 sublane count -> batch padding target
_LANE = 128                   # lane width


# =============================================================================
# Fused wavefront kernel: both GRU layers + mixture head, all VMEM resident.
# =============================================================================
def _make_mdn_wavefront_kernel(*, T, H, M, Bp, lane):
    H2, H3 = 2 * H, 3 * H

    def kernel(x_ref, w_ih0_ref, b_ih0_ref, w_m_ref, b_m_ref,
               w_head_ref, b_head_ref, mu_ref, seq_ref):
        # x_ref:      (T*Bp, D)        f32, time-major (row = t*Bp + b)
        # w_ih0_ref:  (D, lane)        bf16 (cols 0:3H real)
        # w_m_ref:    (2H, 3*lane)     bf16 block weight [W_hh0 | W_ih1 | W_hh1]
        # w_head_ref: (H, lane)        bf16 (cols 0:3M real)
        # mu_ref:     (T*Bp, lane)     f32 output slab
        # seq_ref:    (T*Bp, H)        f32 scratch for layer-1 hidden states

        # Hoisted, time-parallel layer-0 input projection: one bf16 MXU matmul.
        gi0_all = (jnp.dot(x_ref[...].astype(jnp.bfloat16), w_ih0_ref[...],
                           preferred_element_type=jnp.float32)
                   + b_ih0_ref[...])                       # (T*Bp, lane)

        w_m = w_m_ref[...]                                 # (2H, 3*lane) bf16
        b_m = b_m_ref[...]                                 # (1, 3*lane)  f32

        h0 = jnp.zeros((Bp, H), jnp.float32)
        h1 = jnp.zeros((Bp, H), jnp.float32)

        # Wavefront: wave w computes layer-0 step w and layer-1 step w-1.  Both
        # sub-steps read only state from the previous wave, so their recurrent /
        # input-projection matmuls merge into ONE dot on the critical path.
        for w in range(T + 1):                             # static unroll
            h_cat = jnp.concatenate([h0, h1], axis=1).astype(jnp.bfloat16)
            g = jnp.dot(h_cat, w_m, preferred_element_type=jnp.float32) + b_m
            gh0 = g[:, 0:H3]                               # layer-0 recurrent gates
            gi1 = g[:, lane:lane + H3]                     # layer-1 input projection
            gh1 = g[:, 2 * lane:2 * lane + H3]             # layer-1 recurrent gates

            if w < T:                                      # layer-0, step t = w
                gi0 = gi0_all[w * Bp:(w + 1) * Bp, :]      # whole sublane-tile slice
                rz0 = jax.nn.sigmoid(gi0[:, :H2] + gh0[:, :H2])   # fused r|z sigmoid
                n0 = jnp.tanh(gi0[:, H2:H3] + rz0[:, :H] * gh0[:, H2:])
                h0_new = (1.0 - rz0[:, H:]) * n0 + rz0[:, H:] * h0

            if w >= 1:                                     # layer-1, step t = w - 1
                rz1 = jax.nn.sigmoid(gi1[:, :H2] + gh1[:, :H2])
                n1 = jnp.tanh(gi1[:, H2:] + rz1[:, :H] * gh1[:, H2:])
                h1 = (1.0 - rz1[:, H:]) * n1 + rz1[:, H:] * h1
                seq_ref[(w - 1) * Bp:w * Bp, :] = h1       # contiguous time-major write

            if w < T:
                h0 = h0_new

        # Mixture head on all rows at once (off the critical recurrence path).
        seq = seq_ref[...]                                 # (T*Bp, H)
        gh = jnp.tanh(jnp.dot(seq.astype(jnp.bfloat16), w_head_ref[...],
                              preferred_element_type=jnp.float32)
                      + b_head_ref[...])                   # (T*Bp, lane), pad lanes = 0
        gx, gy, gz = gh[:, :M], gh[:, M:2 * M], gh[:, 2 * M:3 * M]
        inv = lax.rsqrt(gx * gx + gy * gy + gz * gz + 1e-12)   # eps: padded rows stay finite
        pad = jnp.zeros((T * Bp, lane - 3 * M), jnp.float32)
        mu_ref[...] = jnp.concatenate([gx * inv, gy * inv, gz * inv, pad], axis=1)

    return kernel


# =============================================================================
# Full forward (mirrors mdn.forward); batch-first (B, T, D) input.
# =============================================================================
@jax.jit
def mdn_forward(h_btd, gru_params, w_all, b_all):
    assert h_btd.ndim == 3
    assert len(gru_params) == 2, "wavefront kernel is specialized to 2 GRU layers"
    B, T, D = h_btd.shape
    H = PREDICTOR_HIDDEN_SIZE
    M = PREDICTOR_MIXTURES
    H3 = 3 * H
    lane = _LANE

    # Pad batch to the f32 sublane count so per-wave tiles are dense.
    Bp = ((B + _SUBLANES_F32 - 1) // _SUBLANES_F32) * _SUBLANES_F32

    # Time-major, batch-padded, flattened input: row index = t*Bp + b.
    x_tm = jnp.transpose(h_btd.astype(jnp.float32), (1, 0, 2))          # (T, B, D)
    x_tm = jnp.pad(x_tm, ((0, 0), (0, Bp - B), (0, 0))).reshape(T * Bp, D)

    (w_ih0, w_hh0, b_ih0, b_hh0), (w_ih1, w_hh1, b_ih1, b_hh1) = gru_params

    # Layer-0 input-projection weight, lane-padded, bf16.
    w_ih0p = (jnp.zeros((D, lane), jnp.float32).at[:, :H3].set(w_ih0.T)
              .astype(jnp.bfloat16))
    b_ih0p = jnp.zeros((1, lane), jnp.float32).at[:, :H3].set(b_ih0)

    # Merged per-wave weight: each 3H gate group in its own 128-lane tile.
    w_m = jnp.zeros((2 * H, 3 * lane), jnp.float32)
    w_m = w_m.at[:H, 0:H3].set(w_hh0.T)                    # layer-0 recurrent
    w_m = w_m.at[:H, lane:lane + H3].set(w_ih1.T)          # layer-1 input proj (from h0)
    w_m = w_m.at[H:, 2 * lane:2 * lane + H3].set(w_hh1.T)  # layer-1 recurrent
    w_m = w_m.astype(jnp.bfloat16)
    b_m = jnp.zeros((1, 3 * lane), jnp.float32)
    b_m = b_m.at[:, 0:H3].set(b_hh0)
    b_m = b_m.at[:, lane:lane + H3].set(b_ih1)
    b_m = b_m.at[:, 2 * lane:2 * lane + H3].set(b_hh1)

    # Head weights, lane-padded, bf16.
    w_headp = (jnp.zeros((H, lane), jnp.float32).at[:, :3 * M].set(w_all.T)
               .astype(jnp.bfloat16))
    b_headp = jnp.zeros((1, lane), jnp.float32).at[:, :3 * M].set(b_all)

    kernel = _make_mdn_wavefront_kernel(T=T, H=H, M=M, Bp=Bp, lane=lane)

    vmem_spec = pl.BlockSpec(memory_space=pltpu.MemorySpace.VMEM)
    flops = 2 * (T * Bp * D * lane                 # hoisted layer-0 projection
                 + (T + 1) * Bp * 2 * H * 3 * lane  # per-wave merged dot
                 + T * Bp * H * lane)               # head
    transcendentals = 2 * T * Bp * 3 * H + T * Bp * lane + T * Bp * M
    bytes_accessed = (x_tm.size * 4 + w_ih0p.size * 2 + b_ih0p.size * 4
                      + w_m.size * 2 + b_m.size * 4 + w_headp.size * 2
                      + b_headp.size * 4 + T * Bp * lane * 4)

    mu = pl.pallas_call(
        kernel,
        out_shape=jax.ShapeDtypeStruct((T * Bp, lane), jnp.float32),
        in_specs=[vmem_spec] * 7,
        out_specs=vmem_spec,
        scratch_shapes=[pltpu.VMEM((T * Bp, H), jnp.float32)],
        cost_estimate=pl.CostEstimate(flops=flops,
                                      transcendentals=transcendentals,
                                      bytes_accessed=bytes_accessed),
    )(x_tm, w_ih0p, b_ih0p, w_m, b_m, w_headp, b_headp)

    # Un-permute the tiny output: strip batch padding + padding lanes,
    # time-major -> batch-first (row b*T + t), then split the [x|y|z] slab.
    mu = mu.reshape(T, Bp, lane)[:, :B, :3 * M]
    mu = jnp.transpose(mu, (1, 0, 2)).reshape(B * T, 3 * M)
    mux, muy, muz = mu[:, :M], mu[:, M:2 * M], mu[:, 2 * M:]
    weight = jnp.full((B * T, M), 0.5, jnp.float32)   # torch.ones(...) * 0.5
    tau = jnp.full((B * T, M), 4.0, jnp.float32)      # torch.ones(...) * 4
    return weight, mux, muy, muz, tau


# =============================================================================
# Parameter construction (deterministic, PyTorch-like uniform init)
# =============================================================================
def init_params(key):
    H, D, L, M = (PREDICTOR_HIDDEN_SIZE, ENCODER_HIDDEN_SIZE,
                  PREDICTOR_LAYERS, PREDICTOR_MIXTURES)
    keys = jax.random.split(key, 4 * L + 2 * M)
    ki = iter(range(len(keys)))
    bound = 1.0 / jnp.sqrt(H)

    gru_params = []
    for layer in range(L):
        d_in = D if layer == 0 else H
        w_ih = jax.random.uniform(keys[next(ki)], (3 * H, d_in), jnp.float32, -bound, bound)
        w_hh = jax.random.uniform(keys[next(ki)], (3 * H, H), jnp.float32, -bound, bound)
        b_ih = jax.random.uniform(keys[next(ki)], (3 * H,), jnp.float32, -bound, bound)
        b_hh = jax.random.uniform(keys[next(ki)], (3 * H,), jnp.float32, -bound, bound)
        gru_params.append((w_ih, w_hh, b_ih, b_hh))

    mu_w, mu_b = [], []
    for _ in range(M):
        mu_w.append(jax.random.uniform(keys[next(ki)], (3, H), jnp.float32, -bound, bound))
        mu_b.append(jax.random.uniform(keys[next(ki)], (3,), jnp.float32, -bound, bound))
    w_stack = jnp.stack(mu_w)   # (M, 3, H)
    b_stack = jnp.stack(mu_b)   # (M, 3)
    # Pack rows as [x-rows of all mixtures | y-rows | z-rows] -> (3M, H), (3M,)
    w_all = jnp.concatenate([w_stack[:, 0, :], w_stack[:, 1, :], w_stack[:, 2, :]], axis=0)
    b_all = jnp.concatenate([b_stack[:, 0], b_stack[:, 1], b_stack[:, 2]], axis=0)

    # TODO(synk): self.weight / self.tau Linear layers and self.dropout exist in the
    # module but are unused in forward (overwritten by constants), so not built here.
    return gru_params, w_all, b_all


# =============================================================================
# Pure-JAX reference (correctness sanity check only)
# =============================================================================
def mdn_forward_ref(h_btd, gru_params, w_all, b_all):
    B, T, _ = h_btd.shape
    x = h_btd
    for (w_ih, w_hh, b_ih, b_hh) in gru_params:
        H = w_hh.shape[1]
        hid = jnp.zeros((B, H), jnp.float32)
        outs = []
        for t in range(T):
            gi = x[:, t, :] @ w_ih.T + b_ih
            gh = hid @ w_hh.T + b_hh
            i_r, i_z, i_n = jnp.split(gi, 3, axis=1)
            h_r, h_z, h_n = jnp.split(gh, 3, axis=1)
            r = jax.nn.sigmoid(i_r + h_r)
            z = jax.nn.sigmoid(i_z + h_z)
            n = jnp.tanh(i_n + r * h_n)
            hid = (1.0 - z) * n + z * hid
            outs.append(hid)
        x = jnp.stack(outs, axis=1)
    h_flat = x.reshape(B * T, -1)
    M = PREDICTOR_MIXTURES
    g = jnp.tanh(h_flat @ w_all.T + b_all)
    gx, gy, gz = g[:, :M], g[:, M:2 * M], g[:, 2 * M:]
    norm = jnp.sqrt(gx * gx + gy * gy + gz * gz)
    mux, muy, muz = gx / norm, gy / norm, gz / norm
    weight = jnp.full_like(mux, 0.5)
    tau = jnp.full_like(mux, 4.0)
    return weight, mux, muy, muz, tau


if __name__ == "__main__":
    key = jax.random.PRNGKey(0)
    k_par, k_in = jax.random.split(key)
    gru_params, w_all, b_all = init_params(k_par)

    B, T = 2, 8
    h_in = jax.random.normal(k_in, (B, T, ENCODER_HIDDEN_SIZE), jnp.float32)

    outs = mdn_forward(h_in, gru_params, w_all, b_all)
    outs = jax.block_until_ready(outs)

    refs = mdn_forward_ref(h_in, gru_params, w_all, b_all)
    names = ["weight", "mux", "muy", "muz", "tau"]
    # Tolerance loosened slightly vs. the pure-f32 version to cover bf16 MXU operands.
    for name, o, r in zip(names, outs, refs):
        assert o.shape == (B * T, PREDICTOR_MIXTURES), (name, o.shape)
        assert jnp.all(jnp.isfinite(o)), name
        assert jnp.allclose(o, r, atol=3e-2, rtol=3e-2), (
            name, float(jnp.max(jnp.abs(o - r))))

    print("KERNEL_OK")
</pallas_src>

<mosaic_0001>
module attributes {stable_mosaic.version = 11 : i64} {
  func.func @kernel(%arg0: memref<64x16xf32, #tpu.memory_space<vmem>>, %arg1: memref<16x128xbf16, #tpu.memory_space<vmem>>, %arg2: memref<1x128xf32, #tpu.memory_space<vmem>>, %arg3: memref<64x384xbf16, #tpu.memory_space<vmem>>, %arg4: memref<1x384xf32, #tpu.memory_space<vmem>>, %arg5: memref<32x128xbf16, #tpu.memory_space<vmem>>, %arg6: memref<1x128xf32, #tpu.memory_space<vmem>>, %arg7: memref<64x128xf32, #tpu.memory_space<vmem>>, %arg8: memref<64x32xf32, #tpu.memory_space<vmem>>) attributes {dimension_semantics = [], scalar_prefetch = 0 : i64, scratch_operands = 1 : i64, tpu.core_type = #tpu.core_type<tc>} {
    %c0 = arith.constant 0 : index
    %c0_0 = arith.constant 0 : index
    %0 = vector.load %arg0[%c0, %c0_0] : memref<64x16xf32, #tpu.memory_space<vmem>>, vector<64x16xf32>
    %1 = arith.truncf %0 : vector<64x16xf32> to vector<64x16xbf16>
    %c0_1 = arith.constant 0 : index
    %c0_2 = arith.constant 0 : index
    %2 = vector.load %arg1[%c0_1, %c0_2] : memref<16x128xbf16, #tpu.memory_space<vmem>>, vector<16x128xbf16>
    %cst = arith.constant dense<0.000000e+00> : vector<64x128xf32>
    %3 = tpu.matmul %1, %2, %cst {dimension_numbers = #tpu.dot_dimension_numbers<[1], [0], [0], [1], [0, 0, 1, 1], [], []>} : vector<64x16xbf16>, vector<16x128xbf16>, vector<64x128xf32> -> vector<64x128xf32>
    %c0_3 = arith.constant 0 : index
    %c0_4 = arith.constant 0 : index
    %4 = vector.load %arg2[%c0_3, %c0_4] : memref<1x128xf32, #tpu.memory_space<vmem>>, vector<1x128xf32>
    %5 = vector.broadcast %4 : vector<1x128xf32> to vector<64x128xf32>
    %6 = arith.addf %3, %5 : vector<64x128xf32>
    %c0_5 = arith.constant 0 : index
    %c0_6 = arith.constant 0 : index
    %7 = vector.load %arg3[%c0_5, %c0_6] : memref<64x384xbf16, #tpu.memory_space<vmem>>, vector<64x384xbf16>
    %c0_7 = arith.constant 0 : index
    %c0_8 = arith.constant 0 : index
    %8 = vector.load %arg4[%c0_7, %c0_8] : memref<1x384xf32, #tpu.memory_space<vmem>>, vector<1x384xf32>
    %cst_9 = arith.constant 0.000000e+00 : f32
    %9 = vector.broadcast %cst_9 : f32 to vector<8x32xf32>
    %cst_10 = arith.constant 0.000000e+00 : f32
    %10 = vector.broadcast %cst_10 : f32 to vector<8x32xf32>
    %11 = tpu.concatenate %9, %10 in 1 : vector<8x32xf32>, vector<8x32xf32> -> vector<8x64xf32>
    %12 = arith.truncf %11 : vector<8x64xf32> to vector<8x64xbf16>
    %cst_11 = arith.constant dense<0.000000e+00> : vector<8x384xf32>
    %13 = tpu.matmul %12, %7, %cst_11 {dimension_numbers = #tpu.dot_dimension_numbers<[1], [0], [0], [1], [0, 0, 1, 1], [], []>} : vector<8x64xbf16>, vector<64x384xbf16>, vector<8x384xf32> -> vector<8x384xf32>
    %14 = vector.broadcast %8 : vector<1x384xf32> to vector<8x384xf32>
    %15 = arith.addf %13, %14 : vector<8x384xf32>
    %16 = vector.extract_strided_slice %15 {offsets = [0, 0], sizes = [8, 96], strides = [1, 1]} : vector<8x384xf32> to vector<8x96xf32>
    %17 = vector.extract_strided_slice %6 {offsets = [0, 0], sizes = [8, 128], strides = [1, 1]} : vector<64x128xf32> to vector<8x128xf32>
    %18 = vector.extract_strided_slice %17 {offsets = [0, 0], sizes = [8, 64], strides = [1, 1]} : vector<8x128xf32> to vector<8x64xf32>
    %19 = vector.extract_strided_slice %16 {offsets = [0, 0], sizes = [8, 64], strides = [1, 1]} : vector<8x96xf32> to vector<8x64xf32>
    %20 = arith.addf %18, %19 : vector<8x64xf32>
    %21 = arith.negf %20 : vector<8x64xf32>
    %22 = math.exp %21 : vector<8x64xf32>
    %cst_12 = arith.constant 1.000000e+00 : f32
    %23 = vector.broadcast %cst_12 : f32 to vector<8x64xf32>
    %24 = arith.addf %23, %22 : vector<8x64xf32>
    %25 = arith.divf %23, %24 : vector<8x64xf32>
    %26 = vector.extract_strided_slice %17 {offsets = [0, 64], sizes = [8, 32], strides = [1, 1]} : vector<8x128xf32> to vector<8x32xf32>
    %27 = vector.extract_strided_slice %25 {offsets = [0, 0], sizes = [8, 32], strides = [1, 1]} : vector<8x64xf32> to vector<8x32xf32>
    %28 = vector.extract_strided_slice %16 {offsets = [0, 64], sizes = [8, 32], strides = [1, 1]} : vector<8x96xf32> to vector<8x32xf32>
    %29 = arith.mulf %27, %28 : vector<8x32xf32>
    %30 = arith.addf %26, %29 : vector<8x32xf32>
    %31 = math.tanh %30 : vector<8x32xf32>
    %32 = vector.extract_strided_slice %25 {offsets = [0, 32], sizes = [8, 32], strides = [1, 1]} : vector<8x64xf32> to vector<8x32xf32>
    %cst_13 = arith.constant 1.000000e+00 : f32
    %33 = vector.broadcast %cst_13 : f32 to vector<8x32xf32>
    %34 = arith.subf %33, %32 : vector<8x32xf32>
    %35 = arith.mulf %34, %31 : vector<8x32xf32>
    %36 = vector.extract_strided_slice %25 {offsets = [0, 32], sizes = [8, 32], strides = [1, 1]} : vector<8x64xf32> to vector<8x32xf32>
    %37 = arith.mulf %36, %9 : vector<8x32xf32>
    %38 = arith.addf %35, %37 : vector<8x32xf32>
    %39 = tpu.concatenate %38, %10 in 1 : vector<8x32xf32>, vector<8x32xf32> -> vector<8x64xf32>
    %40 = arith.truncf %39 : vector<8x64xf32> to vector<8x64xbf16>
    %cst_14 = arith.constant dense<0.000000e+00> : vector<8x384xf32>
    %41 = tpu.matmul %40, %7, %cst_14 {dimension_numbers = #tpu.dot_dimension_numbers<[1], [0], [0], [1], [0, 0, 1, 1], [], []>} : vector<8x64xbf16>, vector<64x384xbf16>, vector<8x384xf32> -> vector<8x384xf32>
    %42 = vector.broadcast %8 : vector<1x384xf32> to vector<8x384xf32>
    %43 = arith.addf %41, %42 : vector<8x384xf32>
    %44 = vector.extract_strided_slice %43 {offsets = [0, 0], sizes = [8, 96], strides = [1, 1]} : vector<8x384xf32> to vector<8x96xf32>
    %45 = vector.extract_strided_slice %43 {offsets = [0, 128], sizes = [8, 96], strides = [1, 1]} : vector<8x384xf32> to vector<8x96xf32>
    %46 = vector.extract_strided_slice %43 {offsets = [0, 256], sizes = [8, 96], strides = [1, 1]} : vector<8x384xf32> to vector<8x96xf32>
    %47 = vector.extract_strided_slice %6 {offsets = [8, 0], sizes = [8, 128], strides = [1, 1]} : vector<64x128xf32> to vector<8x128xf32>
    %48 = vector.extract_strided_slice %47 {offsets = [0, 0], sizes = [8, 64], strides = [1, 1]} : vector<8x128xf32> to vector<8x64xf32>
    %49 = vector.extract_strided_slice %44 {offsets = [0, 0], sizes = [8, 64], strides = [1, 1]} : vector<8x96xf32> to vector<8x64xf32>
    %50 = arith.addf %48, %49 : vector<8x64xf32>
    %51 = arith.negf %50 : vector<8x64xf32>
    %52 = math.exp %51 : vector<8x64xf32>
    %cst_15 = arith.constant 1.000000e+00 : f32
    %53 = vector.broadcast %cst_15 : f32 to vector<8x64xf32>
    %54 = arith.addf %53, %52 : vector<8x64xf32>
    %55 = arith.divf %53, %54 : vector<8x64xf32>
    %56 = vector.extract_strided_slice %47 {offsets = [0, 64], sizes = [8, 32], strides = [1, 1]} : vector<8x128xf32> to vector<8x32xf32>
    %57 = vector.extract_strided_slice %55 {offsets = [0, 0], sizes = [8, 32], strides = [1, 1]} : vector<8x64xf32> to vector<8x32xf32>
    %58 = vector.extract_strided_slice %44 {offsets = [0, 64], sizes = [8, 32], strides = [1, 1]} : vector<8x96xf32> to vector<8x32xf32>
    %59 = arith.mulf %57, %58 : vector<8x32xf32>
    %60 = arith.addf %56, %59 : vector<8x32xf32>
    %61 = math.tanh %60 : vector<8x32xf32>
    %62 = vector.extract_strided_slice %55 {offsets = [0, 32], sizes = [8, 32], strides = [1, 1]} : vector<8x64xf32> to vector<8x32xf32>
    %cst_16 = arith.constant 1.000000e+00 : f32
    %63 = vector.broadcast %cst_16 : f32 to vector<8x32xf32>
    %64 = arith.subf %63, %62 : vector<8x32xf32>
    %65 = arith.mulf %64, %61 : vector<8x32xf32>
    %66 = vector.extract_strided_slice %55 {offsets = [0, 32], sizes = [8, 32], strides = [1, 1]} : vector<8x64xf32> to vector<8x32xf32>
    %67 = arith.mulf %66, %38 : vector<8x32xf32>
    %68 = arith.addf %65, %67 : vector<8x32xf32>
    %69 = vector.extract_strided_slice %45 {offsets = [0, 0], sizes = [8, 64], strides = [1, 1]} : vector<8x96xf32> to vector<8x64xf32>
    %70 = vector.extract_strided_slice %46 {offsets = [0, 0], sizes = [8, 64], strides = [1, 1]} : vector<8x96xf32> to vector<8x64xf32>
    %71 = arith.addf %69, %70 : vector<8x64xf32>
    %72 = arith.negf %71 : vector<8x64xf32>
    %73 = math.exp %72 : vector<8x64xf32>
    %cst_17 = arith.constant 1.000000e+00 : f32
    %74 = vector.broadcast %cst_17 : f32 to vector<8x64xf32>
    %75 = arith.addf %74, %73 : vector<8x64xf32>
    %76 = arith.divf %74, %75 : vector<8x64xf32>
    %77 = vector.extract_strided_slice %45 {offsets = [0, 64], sizes = [8, 32], strides = [1, 1]} : vector<8x96xf32> to vector<8x32xf32>
    %78 = vector.extract_strided_slice %76 {offsets = [0, 0], sizes = [8, 32], strides = [1, 1]} : vector<8x64xf32> to vector<8x32xf32>
    %79 = vector.extract_strided_slice %46 {offsets = [0, 64], sizes = [8, 32], strides = [1, 1]} : vector<8x96xf32> to vector<8x32xf32>
    %80 = arith.mulf %78, %79 : vector<8x32xf32>
    %81 = arith.addf %77, %80 : vector<8x32xf32>
    %82 = math.tanh %81 : vector<8x32xf32>
    %83 = vector.extract_strided_slice %76 {offsets = [0, 32], sizes = [8, 32], strides = [1, 1]} : vector<8x64xf32> to vector<8x32xf32>
    %cst_18 = arith.constant 1.000000e+00 : f32
    %84 = vector.broadcast %cst_18 : f32 to vector<8x32xf32>
    %85 = arith.subf %84, %83 : vector<8x32xf32>
    %86 = arith.mulf %85, %82 : vector<8x32xf32>
    %87 = vector.extract_strided_slice %76 {offsets = [0, 32], sizes = [8, 32], strides = [1, 1]} : vector<8x64xf32> to vector<8x32xf32>
    %88 = arith.mulf %87, %10 : vector<8x32xf32>
    %89 = arith.addf %86, %88 : vector<8x32xf32>
    %c0_19 = arith.constant 0 : index
    %c0_20 = arith.constant 0 : index
    %90 = vector.load %arg8[%c0_19, %c0_20] : memref<64x32xf32, #tpu.memory_space<vmem>>, vector<8x32xf32>
    tpu.vector_store %arg8[%c0_19, %c0_20], %89 {strides = array<i32>} : memref<64x32xf32, #tpu.memory_space<vmem>>, vector<8x32xf32>,
    %91 = tpu.concatenate %68, %89 in 1 : vector<8x32xf32>, vector<8x32xf32> -> vector<8x64xf32>
    %92 = arith.truncf %91 : vector<8x64xf32> to vector<8x64xbf16>
    %cst_21 = arith.constant dense<0.000000e+00> : vector<8x384xf32>
    %93 = tpu.matmul %92, %7, %cst_21 {dimension_numbers = #tpu.dot_dimension_numbers<[1], [0], [0], [1], [0, 0, 1, 1], [], []>} : vector<8x64xbf16>, vector<64x384xbf16>, vector<8x384xf32> -> vector<8x384xf32>
    %94 = vector.broadcast %8 : vector<1x384xf32> to vector<8x384xf32>
    %95 = arith.addf %93, %94 : vector<8x384xf32>
    %96 = vector.extract_strided_slice %95 {offsets = [0, 0], sizes = [8, 96], strides = [1, 1]} : vector<8x384xf32> to vector<8x96xf32>
    %97 = vector.extract_strided_slice %95 {offsets = [0, 128], sizes = [8, 96], strides = [1, 1]} : vector<8x384xf32> to vector<8x96xf32>
    %98 = vector.extract_strided_slice %95 {offsets = [0, 256], sizes = [8, 96], strides = [1, 1]} : vector<8x384xf32> to vector<8x96xf32>
    %99 = vector.extract_strided_slice %6 {offsets = [16, 0], sizes = [8, 128], strides = [1, 1]} : vector<64x128xf32> to vector<8x128xf32>
    %100 = vector.extract_strided_slice %99 {offsets = [0, 0], sizes = [8, 64], strides = [1, 1]} : vector<8x128xf32> to vector<8x64xf32>
    %101 = vector.extract_strided_slice %96 {offsets = [0, 0], sizes = [8, 64], strides = [1, 1]} : vector<8x96xf32> to vector<8x64xf32>
    %102 = arith.addf %100, %101 : vector<8x64xf32>
    %103 = arith.negf %102 : vector<8x64xf32>
    %104 = math.exp %103 : vector<8x64xf32>
    %cst_22 = arith.constant 1.000000e+00 : f32
    %105 = vector.broadcast %cst_22 : f32 to vector<8x64xf32>
    %106 = arith.addf %105, %104 : vector<8x64xf32>
    %107 = arith.divf %105, %106 : vector<8x64xf32>
    %108 = vector.extract_strided_slice %99 {offsets = [0, 64], sizes = [8, 32], strides = [1, 1]} : vector<8x128xf32> to vector<8x32xf32>
    %109 = vector.extract_strided_slice %107 {offsets = [0, 0], sizes = [8, 32], strides = [1, 1]} : vector<8x64xf32> to vector<8x32xf32>
    %110 = vector.extract_strided_slice %96 {offsets = [0, 64], sizes = [8, 32], strides = [1, 1]} : vector<8x96xf32> to vector<8x32xf32>
    %111 = arith.mulf %109, %110 : vector<8x32xf32>
    %112 = arith.addf %108, %111 : vector<8x32xf32>
    %113 = math.tanh %112 : vector<8x32xf32>
    %114 = vector.extract_strided_slice %107 {offsets = [0, 32], sizes = [8, 32], strides = [1, 1]} : vector<8x64xf32> to vector<8x32xf32>
    %cst_23 = arith.constant 1.000000e+00 : f32
    %115 = vector.broadcast %cst_23 : f32 to vector<8x32xf32>
    %116 = arith.subf %115, %114 : vector<8x32xf32>
    %117 = arith.mulf %116, %113 : vector<8x32xf32>
    %118 = vector.extract_strided_slice %107 {offsets = [0, 32], sizes = [8, 32], strides = [1, 1]} : vector<8x64xf32> to vector<8x32xf32>
    %119 = arith.mulf %118, %68 : vector<8x32xf32>
    %120 = arith.addf %117, %119 : vector<8x32xf32>
    %121 = vector.extract_strided_slice %97 {offsets = [0, 0], sizes = [8, 64], strides = [1, 1]} : vector<8x96xf32> to vector<8x64xf32>
    %122 = vector.extract_strided_slice %98 {offsets = [0, 0], sizes = [8, 64], strides = [1, 1]} : vector<8x96xf32> to vector<8x64xf32>
    %123 = arith.addf %121, %122 : vector<8x64xf32>
    %124 = arith.negf %123 : vector<8x64xf32>
    %125 = math.exp %124 : vector<8x64xf32>
    %cst_24 = arith.constant 1.000000e+00 : f32
    %126 = vector.broadcast %cst_24 : f32 to vector<8x64xf32>
    %127 = arith.addf %126, %125 : vector<8x64xf32>
    %128 = arith.divf %126, %127 : vector<8x64xf32>
    %129 = vector.extract_strided_slice %97 {offsets = [0, 64], sizes = [8, 32], strides = [1, 1]} : vector<8x96xf32> to vector<8x32xf32>
    %130 = vector.extract_strided_slice %128 {offsets = [0, 0], sizes = [8, 32], strides = [1, 1]} : vector<8x64xf32> to vector<8x32xf32>
    %131 = vector.extract_strided_slice %98 {offsets = [0, 64], sizes = [8, 32], strides = [1, 1]} : vector<8x96xf32> to vector<8x32xf32>
    %132 = arith.mulf %130, %131 : vector<8x32xf32>
    %133 = arith.addf %129, %132 : vector<8x32xf32>
    %134 = math.tanh %133 : vector<8x32xf32>
    %135 = vector.extract_strided_slice %128 {offsets = [0, 32], sizes = [8, 32], strides = [1, 1]} : vector<8x64xf32> to vector<8x32xf32>
    %cst_25 = arith.constant 1.000000e+00 : f32
    %136 = vector.broadcast %cst_25 : f32 to vector<8x32xf32>
    %137 = arith.subf %136, %135 : vector<8x32xf32>
    %138 = arith.mulf %137, %134 : vector<8x32xf32>
    %139 = vector.extract_strided_slice %128 {offsets = [0, 32], sizes = [8, 32], strides = [1, 1]} : vector<8x64xf32> to vector<8x32xf32>
    %140 = arith.mulf %139, %89 : vector<8x32xf32>
    %141 = arith.addf %138, %140 : vector<8x32xf32>
    %c8 = arith.constant 8 : index
    %c0_26 = arith.constant 0 : index
    %142 = vector.load %arg8[%c8, %c0_26] : memref<64x32xf32, #tpu.memory_space<vmem>>, vector<8x32xf32>
    tpu.vector_store %arg8[%c8, %c0_26], %141 {strides = array<i32>} : memref<64x32xf32, #tpu.memory_space<vmem>>, vector<8x32xf32>,
    %143 = tpu.concatenate %120, %141 in 1 : vector<8x32xf32>, vector<8x32xf32> -> vector<8x64xf32>
    %144 = arith.truncf %143 : vector<8x64xf32> to vector<8x64xbf16>
    %cst_27 = arith.constant dense<0.000000e+00> : vector<8x384xf32>
    %145 = tpu.matmul %144, %7, %cst_27 {dimension_numbers = #tpu.dot_dimension_numbers<[1], [0], [0], [1], [0, 0, 1, 1], [], []>} : vector<8x64xbf16>, vector<64x384xbf16>, vector<8x384xf32> -> vector<8x384xf32>
    %146 = vector.broadcast %8 : vector<1x384xf32> to vector<8x384xf32>
    %147 = arith.addf %145, %146 : vector<8x384xf32>
    %148 = vector.extract_strided_slice %147 {offsets = [0, 0], sizes = [8, 96], strides = [1, 1]} : vector<8x384xf32> to vector<8x96xf32>
    %149 = vector.extract_strided_slice %147 {offsets = [0, 128], sizes = [8, 96], strides = [1, 1]} : vector<8x384xf32> to vector<8x96xf32>
    %150 = vector.extract_strided_slice %147 {offsets = [0, 256], sizes = [8, 96], strides = [1, 1]} : vector<8x384xf32> to vector<8x96xf32>
    %151 = vector.extract_strided_slice %6 {offsets = [24, 0], sizes = [8, 128], strides = [1, 1]} : vector<64x128xf32> to vector<8x128xf32>
    %152 = vector.extract_strided_slice %151 {offsets = [0, 0], sizes = [8, 64], strides = [1, 1]} : vector<8x128xf32> to vector<8x64xf32>
    %153 = vector.extract_strided_slice %148 {offsets = [0, 0], sizes = [8, 64], strides = [1, 1]} : vector<8x96xf32> to vector<8x64xf32>
    %154 = arith.addf %152, %153 : vector<8x64xf32>
    %155 = arith.negf %154 : vector<8x64xf32>
    %156 = math.exp %155 : vector<8x64xf32>
    %cst_28 = arith.constant 1.000000e+00 : f32
    %157 = vector.broadcast %cst_28 : f32 to vector<8x64xf32>
    %158 = arith.addf %157, %156 : vector<8x64xf32>
    %159 = arith.divf %157, %158 : vector<8x64xf32>
    %160 = vector.extract_strided_slice %151 {offsets = [0, 64], sizes = [8, 32], strides = [1, 1]} : vector<8x128xf32> to vector<8x32xf32>
    %161 = vector.extract_strided_slice %159 {offsets = [0, 0], sizes = [8, 32], strides = [1, 1]} : vector<8x64xf32> to vector<8x32xf32>
    %162 = vector.extract_strided_slice %148 {offsets = [0, 64], sizes = [8, 32], strides = [1, 1]} : vector<8x96xf32> to vector<8x32xf32>
    %163 = arith.mulf %161, %162 : vector<8x32xf32>
    %164 = arith.addf %160, %163 : vector<8x32xf32>
    %165 = math.tanh %164 : vector<8x32xf32>
    %166 = vector.extract_strided_slice %159 {offsets = [0, 32], sizes = [8, 32], strides = [1, 1]} : vector<8x64xf32> to vector<8x32xf32>
    %cst_29 = arith.constant 1.000000e+00 : f32
    %167 = vector.broadcast %cst_29 : f32 to vector<8x32xf32>
    %168 = arith.subf %167, %166 : vector<8x32xf32>
    %169 = arith.mulf %168, %165 : vector<8x32xf32>
    %170 = vector.extract_strided_slice %159 {offsets = [0, 32], sizes = [8, 32], strides = [1, 1]} : vector<8x64xf32> to vector<8x32xf32>
    %171 = arith.mulf %170, %120 : vector<8x32xf32>
    %172 = arith.addf %169, %171 : vector<8x32xf32>
    %173 = vector.extract_strided_slice %149 {offsets = [0, 0], sizes = [8, 64], strides = [1, 1]} : vector<8x96xf32> to vector<8x64xf32>
    %174 = vector.extract_strided_slice %150 {offsets = [0, 0], sizes = [8, 64], strides = [1, 1]} : vector<8x96xf32> to vector<8x64xf32>
    %175 = arith.addf %173, %174 : vector<8x64xf32>
    %176 = arith.negf %175 : vector<8x64xf32>
    %177 = math.exp %176 : vector<8x64xf32>
    %cst_30 = arith.constant 1.000000e+00 : f32
    %178 = vector.broadcast %cst_30 : f32 to vector<8x64xf32>
    %179 = arith.addf %178, %177 : vector<8x64xf32>
    %180 = arith.divf %178, %179 : vector<8x64xf32>
    %181 = vector.extract_strided_slice %149 {offsets = [0, 64], sizes = [8, 32], strides = [1, 1]} : vector<8x96xf32> to vector<8x32xf32>
    %182 = vector.extract_strided_slice %180 {offsets = [0, 0], sizes = [8, 32], strides = [1, 1]} : vector<8x64xf32> to vector<8x32xf32>
    %183 = vector.extract_strided_slice %150 {offsets = [0, 64], sizes = [8, 32], strides = [1, 1]} : vector<8x96xf32> to vector<8x32xf32>
    %184 = arith.mulf %182, %183 : vector<8x32xf32>
    %185 = arith.addf %181, %184 : vector<8x32xf32>
    %186 = math.tanh %185 : vector<8x32xf32>
    %187 = vector.extract_strided_slice %180 {offsets = [0, 32], sizes = [8, 32], strides = [1, 1]} : vector<8x64xf32> to vector<8x32xf32>
    %cst_31 = arith.constant 1.000000e+00 : f32
    %188 = vector.broadcast %cst_31 : f32 to vector<8x32xf32>
    %189 = arith.subf %188, %187 : vector<8x32xf32>
    %190 = arith.mulf %189, %186 : vector<8x32xf32>
    %191 = vector.extract_strided_slice %180 {offsets = [0, 32], sizes = [8, 32], strides = [1, 1]} : vector<8x64xf32> to vector<8x32xf32>
    %192 = arith.mulf %191, %141 : vector<8x32xf32>
    %193 = arith.addf %190, %192 : vector<8x32xf32>
    %c16 = arith.constant 16 : index
    %c0_32 = arith.constant 0 : index
    %194 = vector.load %arg8[%c16, %c0_32] : memref<64x32xf32, #tpu.memory_space<vmem>>, vector<8x32xf32>
    tpu.vector_store %arg8[%c16, %c0_32], %193 {strides = array<i32>} : memref<64x32xf32, #tpu.memory_space<vmem>>, vector<8x32xf32>,
    %195 = tpu.concatenate %172, %193 in 1 : vector<8x32xf32>, vector<8x32xf32> -> vector<8x64xf32>
    %196 = arith.truncf %195 : vector<8x64xf32> to vector<8x64xbf16>
    %cst_33 = arith.constant dense<0.000000e+00> : vector<8x384xf32>
    %197 = tpu.matmul %196, %7, %cst_33 {dimension_numbers = #tpu.dot_dimension_numbers<[1], [0], [0], [1], [0, 0, 1, 1], [], []>} : vector<8x64xbf16>, vector<64x384xbf16>, vector<8x384xf32> -> vector<8x384xf32>
    %198 = vector.broadcast %8 : vector<1x384xf32> to vector<8x384xf32>
    %199 = arith.addf %197, %198 : vector<8x384xf32>
    %200 = vector.extract_strided_slice %199 {offsets = [0, 0], sizes = [8, 96], strides = [1, 1]} : vector<8x384xf32> to vector<8x96xf32>
    %201 = vector.extract_strided_slice %199 {offsets = [0, 128], sizes = [8, 96], strides = [1, 1]} : vector<8x384xf32> to vector<8x96xf32>
    %202 = vector.extract_strided_slice %199 {offsets = [0, 256], sizes = [8, 96], strides = [1, 1]} : vector<8x384xf32> to vector<8x96xf32>
    %203 = vector.extract_strided_slice %6 {offsets = [32, 0], sizes = [8, 128], strides = [1, 1]} : vector<64x128xf32> to vector<8x128xf32>
    %204 = vector.extract_strided_slice %203 {offsets = [0, 0], sizes = [8, 64], strides = [1, 1]} : vector<8x128xf32> to vector<8x64xf32>
    %205 = vector.extract_strided_slice %200 {offsets = [0, 0], sizes = [8, 64], strides = [1, 1]} : vector<8x96xf32> to vector<8x64xf32>
    %206 = arith.addf %204, %205 : vector<8x64xf32>
    %207 = arith.negf %206 : vector<8x64xf32>
    %208 = math.exp %207 : vector<8x64xf32>
    %cst_34 = arith.constant 1.000000e+00 : f32
    %209 = vector.broadcast %cst_34 : f32 to vector<8x64xf32>
    %210 = arith.addf %209, %208 : vector<8x64xf32>
    %211 = arith.divf %209, %210 : vector<8x64xf32>
    %212 = vector.extract_strided_slice %203 {offsets = [0, 64], sizes = [8, 32], strides = [1, 1]} : vector<8x128xf32> to vector<8x32xf32>
    %213 = vector.extract_strided_slice %211 {offsets = [0, 0], sizes = [8, 32], strides = [1, 1]} : vector<8x64xf32> to vector<8x32xf32>
    %214 = vector.extract_strided_slice %200 {offsets = [0, 64], sizes = [8, 32], strides = [1, 1]} : vector<8x96xf32> to vector<8x32xf32>
    %215 = arith.mulf %213, %214 : vector<8x32xf32>
    %216 = arith.addf %212, %215 : vector<8x32xf32>
    %217 = math.tanh %216 : vector<8x32xf32>
    %218 = vector.extract_strided_slice %211 {offsets = [0, 32], sizes = [8, 32], strides = [1, 1]} : vector<8x64xf32> to vector<8x32xf32>
    %cst_35 = arith.constant 1.000000e+00 : f32
    %219 = vector.broadcast %cst_35 : f32 to vector<8x32xf32>
    %220 = arith.subf %219, %218 : vector<8x32xf32>
    %221 = arith.mulf %220, %217 : vector<8x32xf32>
    %222 = vector.extract_strided_slice %211 {offsets = [0, 32], sizes = [8, 32], strides = [1, 1]} : vector<8x64xf32> to vector<8x32xf32>
    %223 = arith.mulf %222, %172 : vector<8x32xf32>
    %224 = arith.addf %221, %223 : vector<8x32xf32>
    %225 = vector.extract_strided_slice %201 {offsets = [0, 0], sizes = [8, 64], strides = [1, 1]} : vector<8x96xf32> to vector<8x64xf32>
    %226 = vector.extract_strided_slice %202 {offsets = [0, 0], sizes = [8, 64], strides = [1, 1]} : vector<8x96xf32> to vector<8x64xf32>
    %227 = arith.addf %225, %226 : vector<8x64xf32>
    %228 = arith.negf %227 : vector<8x64xf32>
    %229 = math.exp %228 : vector<8x64xf32>
    %cst_36 = arith.constant 1.000000e+00 : f32
    %230 = vector.broadcast %cst_36 : f32 to vector<8x64xf32>
    %231 = arith.addf %230, %229 : vector<8x64xf32>
    %232 = arith.divf %230, %231 : vector<8x64xf32>
    %233 = vector.extract_strided_slice %201 {offsets = [0, 64], sizes = [8, 32], strides = [1, 1]} : vector<8x96xf32> to vector<8x32xf32>
    %234 = vector.extract_strided_slice %232 {offsets = [0, 0], sizes = [8, 32], strides = [1, 1]} : vector<8x64xf32> to vector<8x32xf32>
    %235 = vector.extract_strided_slice %202 {offsets = [0, 64], sizes = [8, 32], strides = [1, 1]} : vector<8x96xf32> to vector<8x32xf32>
    %236 = arith.mulf %234, %235 : vector<8x32xf32>
    %237 = arith.addf %233, %236 : vector<8x32xf32>
    %238 = math.tanh %237 : vector<8x32xf32>
    %239 = vector.extract_strided_slice %232 {offsets = [0, 32], sizes = [8, 32], strides = [1, 1]} : vector<8x64xf32> to vector<8x32xf32>
    %cst_37 = arith.constant 1.000000e+00 : f32
    %240 = vector.broadcast %cst_37 : f32 to vector<8x32xf32>
    %241 = arith.subf %240, %239 : vector<8x32xf32>
    %242 = arith.mulf %241, %238 : vector<8x32xf32>
    %243 = vector.extract_strided_slice %232 {offsets = [0, 32], sizes = [8, 32], strides = [1, 1]} : vector<8x64xf32> to vector<8x32xf32>
    %244 = arith.mulf %243, %193 : vector<8x32xf32>
    %245 = arith.addf %242, %244 : vector<8x32xf32>
    %c24 = arith.constant 24 : index
    %c0_38 = arith.constant 0 : index
    %246 = vector.load %arg8[%c24, %c0_38] : memref<64x32xf32, #tpu.memory_space<vmem>>, vector<8x32xf32>
    tpu.vector_store %arg8[%c24, %c0_38], %245 {strides = array<i32>} : memref<64x32xf32, #tpu.memory_space<vmem>>, vector<8x32xf32>,
    %247 = tpu.concatenate %224, %245 in 1 : vector<8x32xf32>, vector<8x32xf32> -> vector<8x64xf32>
    %248 = arith.truncf %247 : vector<8x64xf32> to vector<8x64xbf16>
    %cst_39 = arith.constant dense<0.000000e+00> : vector<8x384xf32>
    %249 = tpu.matmul %248, %7, %cst_39 {dimension_numbers = #tpu.dot_dimension_numbers<[1], [0], [0], [1], [0, 0, 1, 1], [], []>} : vector<8x64xbf16>, vector<64x384xbf16>, vector<8x384xf32> -> vector<8x384xf32>
    %250 = vector.broadcast %8 : vector<1x384xf32> to vector<8x384xf32>
    %251 = arith.addf %249, %250 : vector<8x384xf32>
    %252 = vector.extract_strided_slice %251 {offsets = [0, 0], sizes = [8, 96], strides = [1, 1]} : vector<8x384xf32> to vector<8x96xf32>
    %253 = vector.extract_strided_slice %251 {offsets = [0, 128], sizes = [8, 96], strides = [1, 1]} : vector<8x384xf32> to vector<8x96xf32>
    %254 = vector.extract_strided_slice %251 {offsets = [0, 256], sizes = [8, 96], strides = [1, 1]} : vector<8x384xf32> to vector<8x96xf32>
    %255 = vector.extract_strided_slice %6 {offsets = [40, 0], sizes = [8, 128], strides = [1, 1]} : vector<64x128xf32> to vector<8x128xf32>
    %256 = vector.extract_strided_slice %255 {offsets = [0, 0], sizes = [8, 64], strides = [1, 1]} : vector<8x128xf32> to vector<8x64xf32>
    %257 = vector.extract_strided_slice %252 {offsets = [0, 0], sizes = [8, 64], strides = [1, 1]} : vector<8x96xf32> to vector<8x64xf32>
    %258 = arith.addf %256, %257 : vector<8x64xf32>
    %259 = arith.negf %258 : vector<8x64xf32>
    %260 = math.exp %259 : vector<8x64xf32>
    %cst_40 = arith.constant 1.000000e+00 : f32
    %261 = vector.broadcast %cst_40 : f32 to vector<8x64xf32>
    %262 = arith.addf %261, %260 : vector<8x64xf32>
    %263 = arith.divf %261, %262 : vector<8x64xf32>
    %264 = vector.extract_strided_slice %255 {offsets = [0, 64], sizes = [8, 32], strides = [1, 1]} : vector<8x128xf32> to vector<8x32xf32>
    %265 = vector.extract_strided_slice %263 {offsets = [0, 0], sizes = [8, 32], strides = [1, 1]} : vector<8x64xf32> to vector<8x32xf32>
    %266 = vector.extract_strided_slice %252 {offsets = [0, 64], sizes = [8, 32], strides = [1, 1]} : vector<8x96xf32> to vector<8x32xf32>
    %267 = arith.mulf %265, %266 : vector<8x32xf32>
    %268 = arith.addf %264, %267 : vector<8x32xf32>
    %269 = math.tanh %268 : vector<8x32xf32>
    %270 = vector.extract_strided_slice %263 {offsets = [0, 32], sizes = [8, 32], strides = [1, 1]} : vector<8x64xf32> to vector<8x32xf32>
    %cst_41 = arith.constant 1.000000e+00 : f32
    %271 = vector.broadcast %cst_41 : f32 to vector<8x32xf32>
    %272 = arith.subf %271, %270 : vector<8x32xf32>
    %273 = arith.mulf %272, %269 : vector<8x32xf32>
    %274 = vector.extract_strided_slice %263 {offsets = [0, 32], sizes = [8, 32], strides = [1, 1]} : vector<8x64xf32> to vector<8x32xf32>
    %275 = arith.mulf %274, %224 : vector<8x32xf32>
    %276 = arith.addf %273, %275 : vector<8x32xf32>
    %277 = vector.extract_strided_slice %253 {offsets = [0, 0], sizes = [8, 64], strides = [1, 1]} : vector<8x96xf32> to vector<8x64xf32>
    %278 = vector.extract_strided_slice %254 {offsets = [0, 0], sizes = [8, 64], strides = [1, 1]} : vector<8x96xf32> to vector<8x64xf32>
    %279 = arith.addf %277, %278 : vector<8x64xf32>
    %280 = arith.negf %279 : vector<8x64xf32>
    %281 = math.exp %280 : vector<8x64xf32>
    %cst_42 = arith.constant 1.000000e+00 : f32
    %282 = vector.broadcast %cst_42 : f32 to vector<8x64xf32>
    %283 = arith.addf %282, %281 : vector<8x64xf32>
    %284 = arith.divf %282, %283 : vector<8x64xf32>
    %285 = vector.extract_strided_slice %253 {offsets = [0, 64], sizes = [8, 32], strides = [1, 1]} : vector<8x96xf32> to vector<8x32xf32>
    %286 = vector.extract_strided_slice %284 {offsets = [0, 0], sizes = [8, 32], strides = [1, 1]} : vector<8x64xf32> to vector<8x32xf32>
    %287 = vector.extract_strided_slice %254 {offsets = [0, 64], sizes = [8, 32], strides = [1, 1]} : vector<8x96xf32> to vector<8x32xf32>
    %288 = arith.mulf %286, %287 : vector<8x32xf32>
    %289 = arith.addf %285, %288 : vector<8x32xf32>
    %290 = math.tanh %289 : vector<8x32xf32>
    %291 = vector.extract_strided_slice %284 {offsets = [0, 32], sizes = [8, 32], strides = [1, 1]} : vector<8x64xf32> to vector<8x32xf32>
    %cst_43 = arith.constant 1.000000e+00 : f32
    %292 = vector.broadcast %cst_43 : f32 to vector<8x32xf32>
    %293 = arith.subf %292, %291 : vector<8x32xf32>
    %294 = arith.mulf %293, %290 : vector<8x32xf32>
    %295 = vector.extract_strided_slice %284 {offsets = [0, 32], sizes = [8, 32], strides = [1, 1]} : vector<8x64xf32> to vector<8x32xf32>
    %296 = arith.mulf %295, %245 : vector<8x32xf32>
    %297 = arith.addf %294, %296 : vector<8x32xf32>
    %c32 = arith.constant 32 : index
    %c0_44 = arith.constant 0 : index
    %298 = vector.load %arg8[%c32, %c0_44] : memref<64x32xf32, #tpu.memory_space<vmem>>, vector<8x32xf32>
    tpu.vector_store %arg8[%c32, %c0_44], %297 {strides = array<i32>} : memref<64x32xf32, #tpu.memory_space<vmem>>, vector<8x32xf32>,
    %299 = tpu.concatenate %276, %297 in 1 : vector<8x32xf32>, vector<8x32xf32> -> vector<8x64xf32>
    %300 = arith.truncf %299 : vector<8x64xf32> to vector<8x64xbf16>
    %cst_45 = arith.constant dense<0.000000e+00> : vector<8x384xf32>
    %301 = tpu.matmul %300, %7, %cst_45 {dimension_numbers = #tpu.dot_dimension_numbers<[1], [0], [0], [1], [0, 0, 1, 1], [], []>} : vector<8x64xbf16>, vector<64x384xbf16>, vector<8x384xf32> -> vector<8x384xf32>
    %302 = vector.broadcast %8 : vector<1x384xf32> to vector<8x384xf32>
    %303 = arith.addf %301, %302 : vector<8x384xf32>
    %304 = vector.extract_strided_slice %303 {offsets = [0, 0], sizes = [8, 96], strides = [1, 1]} : vector<8x384xf32> to vector<8x96xf32>
    %305 = vector.extract_strided_slice %303 {offsets = [0, 128], sizes = [8, 96], strides = [1, 1]} : vector<8x384xf32> to vector<8x96xf32>
    %306 = vector.extract_strided_slice %303 {offsets = [0, 256], sizes = [8, 96], strides = [1, 1]} : vector<8x384xf32> to vector<8x96xf32>
    %307 = vector.extract_strided_slice %6 {offsets = [48, 0], sizes = [8, 128], strides = [1, 1]} : vector<64x128xf32> to vector<8x128xf32>
    %308 = vector.extract_strided_slice %307 {offsets = [0, 0], sizes = [8, 64], strides = [1, 1]} : vector<8x128xf32> to vector<8x64xf32>
    %309 = vector.extract_strided_slice %304 {offsets = [0, 0], sizes = [8, 64], strides = [1, 1]} : vector<8x96xf32> to vector<8x64xf32>
    %310 = arith.addf %308, %309 : vector<8x64xf32>
    %311 = arith.negf %310 : vector<8x64xf32>
    %312 = math.exp %311 : vector<8x64xf32>
    %cst_46 = arith.constant 1.000000e+00 : f32
    %313 = vector.broadcast %cst_46 : f32 to vector<8x64xf32>
    %314 = arith.addf %313, %312 : vector<8x64xf32>
    %315 = arith.divf %313, %314 : vector<8x64xf32>
    %316 = vector.extract_strided_slice %307 {offsets = [0, 64], sizes = [8, 32], strides = [1, 1]} : vector<8x128xf32> to vector<8x32xf32>
    %317 = vector.extract_strided_slice %315 {offsets = [0, 0], sizes = [8, 32], strides = [1, 1]} : vector<8x64xf32> to vector<8x32xf32>
    %318 = vector.extract_strided_slice %304 {offsets = [0, 64], sizes = [8, 32], strides = [1, 1]} : vector<8x96xf32> to vector<8x32xf32>
    %319 = arith.mulf %317, %318 : vector<8x32xf32>
    %320 = arith.addf %316, %319 : vector<8x32xf32>
    %321 = math.tanh %320 : vector<8x32xf32>
    %322 = vector.extract_strided_slice %315 {offsets = [0, 32], sizes = [8, 32], strides = [1, 1]} : vector<8x64xf32> to vector<8x32xf32>
    %cst_47 = arith.constant 1.000000e+00 : f32
    %323 = vector.broadcast %cst_47 : f32 to vector<8x32xf32>
    %324 = arith.subf %323, %322 : vector<8x32xf32>
    %325 = arith.mulf %324, %321 : vector<8x32xf32>
    %326 = vector.extract_strided_slice %315 {offsets = [0, 32], sizes = [8, 32], strides = [1, 1]} : vector<8x64xf32> to vector<8x32xf32>
    %327 = arith.mulf %326, %276 : vector<8x32xf32>
    %328 = arith.addf %325, %327 : vector<8x32xf32>
    %329 = vector.extract_strided_slice %305 {offsets = [0, 0], sizes = [8, 64], strides = [1, 1]} : vector<8x96xf32> to vector<8x64xf32>
    %330 = vector.extract_strided_slice %306 {offsets = [0, 0], sizes = [8, 64], strides = [1, 1]} : vector<8x96xf32> to vector<8x64xf32>
    %331 = arith.addf %329, %330 : vector<8x64xf32>
    %332 = arith.negf %331 : vector<8x64xf32>
    %333 = math.exp %332 : vector<8x64xf32>
    %cst_48 = arith.constant 1.000000e+00 : f32
    %334 = vector.broadcast %cst_48 : f32 to vector<8x64xf32>
    %335 = arith.addf %334, %333 : vector<8x64xf32>
    %336 = arith.divf %334, %335 : vector<8x64xf32>
    %337 = vector.extract_strided_slice %305 {offsets = [0, 64], sizes = [8, 32], strides = [1, 1]} : vector<8x96xf32> to vector<8x32xf32>
    %338 = vector.extract_strided_slice %336 {offsets = [0, 0], sizes = [8, 32], strides = [1, 1]} : vector<8x64xf32> to vector<8x32xf32>
    %339 = vector.extract_strided_slice %306 {offsets = [0, 64], sizes = [8, 32], strides = [1, 1]} : vector<8x96xf32> to vector<8x32xf32>
    %340 = arith.mulf %338, %339 : vector<8x32xf32>
    %341 = arith.addf %337, %340 : vector<8x32xf32>
    %342 = math.tanh %341 : vector<8x32xf32>
    %343 = vector.extract_strided_slice %336 {offsets = [0, 32], sizes = [8, 32], strides = [1, 1]} : vector<8x64xf32> to vector<8x32xf32>
    %cst_49 = arith.constant 1.000000e+00 : f32
    %344 = vector.broadcast %cst_49 : f32 to vector<8x32xf32>
    %345 = arith.subf %344, %343 : vector<8x32xf32>
    %346 = arith.mulf %345, %342 : vector<8x32xf32>
    %347 = vector.extract_strided_slice %336 {offsets = [0, 32], sizes = [8, 32], strides = [1, 1]} : vector<8x64xf32> to vector<8x32xf32>
    %348 = arith.mulf %347, %297 : vector<8x32xf32>
    %349 = arith.addf %346, %348 : vector<8x32xf32>
    %c40 = arith.constant 40 : index
    %c0_50 = arith.constant 0 : index
    %350 = vector.load %arg8[%c40, %c0_50] : memref<64x32xf32, #tpu.memory_space<vmem>>, vector<8x32xf32>
    tpu.vector_store %arg8[%c40, %c0_50], %349 {strides = array<i32>} : memref<64x32xf32, #tpu.memory_space<vmem>>, vector<8x32xf32>,
    %351 = tpu.concatenate %328, %349 in 1 : vector<8x32xf32>, vector<8x32xf32> -> vector<8x64xf32>
    %352 = arith.truncf %351 : vector<8x64xf32> to vector<8x64xbf16>
    %cst_51 = arith.constant dense<0.000000e+00> : vector<8x384xf32>
    %353 = tpu.matmul %352, %7, %cst_51 {dimension_numbers = #tpu.dot_dimension_numbers<[1], [0], [0], [1], [0, 0, 1, 1], [], []>} : vector<8x64xbf16>, vector<64x384xbf16>, vector<8x384xf32> -> vector<8x384xf32>
    %354 = vector.broadcast %8 : vector<1x384xf32> to vector<8x384xf32>
    %355 = arith.addf %353, %354 : vector<8x384xf32>
    %356 = vector.extract_strided_slice %355 {offsets = [0, 0], sizes = [8, 96], strides = [1, 1]} : vector<8x384xf32> to vector<8x96xf32>
    %357 = vector.extract_strided_slice %355 {offsets = [0, 128], sizes = [8, 96], strides = [1, 1]} : vector<8x384xf32> to vector<8x96xf32>
    %358 = vector.extract_strided_slice %355 {offsets = [0, 256], sizes = [8, 96], strides = [1, 1]} : vector<8x384xf32> to vector<8x96xf32>
    %359 = vector.extract_strided_slice %6 {offsets = [56, 0], sizes = [8, 128], strides = [1, 1]} : vector<64x128xf32> to vector<8x128xf32>
    %360 = vector.extract_strided_slice %359 {offsets = [0, 0], sizes = [8, 64], strides = [1, 1]} : vector<8x128xf32> to vector<8x64xf32>
    %361 = vector.extract_strided_slice %356 {offsets = [0, 0], sizes = [8, 64], strides = [1, 1]} : vector<8x96xf32> to vector<8x64xf32>
    %362 = arith.addf %360, %361 : vector<8x64xf32>
    %363 = arith.negf %362 : vector<8x64xf32>
    %364 = math.exp %363 : vector<8x64xf32>
    %cst_52 = arith.constant 1.000000e+00 : f32
    %365 = vector.broadcast %cst_52 : f32 to vector<8x64xf32>
    %366 = arith.addf %365, %364 : vector<8x64xf32>
    %367 = arith.divf %365, %366 : vector<8x64xf32>
    %368 = vector.extract_strided_slice %359 {offsets = [0, 64], sizes = [8, 32], strides = [1, 1]} : vector<8x128xf32> to vector<8x32xf32>
    %369 = vector.extract_strided_slice %367 {offsets = [0, 0], sizes = [8, 32], strides = [1, 1]} : vector<8x64xf32> to vector<8x32xf32>
    %370 = vector.extract_strided_slice %356 {offsets = [0, 64], sizes = [8, 32], strides = [1, 1]} : vector<8x96xf32> to vector<8x32xf32>
    %371 = arith.mulf %369, %370 : vector<8x32xf32>
    %372 = arith.addf %368, %371 : vector<8x32xf32>
    %373 = math.tanh %372 : vector<8x32xf32>
    %374 = vector.extract_strided_slice %367 {offsets = [0, 32], sizes = [8, 32], strides = [1, 1]} : vector<8x64xf32> to vector<8x32xf32>
    %cst_53 = arith.constant 1.000000e+00 : f32
    %375 = vector.broadcast %cst_53 : f32 to vector<8x32xf32>
    %376 = arith.subf %375, %374 : vector<8x32xf32>
    %377 = arith.mulf %376, %373 : vector<8x32xf32>
    %378 = vector.extract_strided_slice %367 {offsets = [0, 32], sizes = [8, 32], strides = [1, 1]} : vector<8x64xf32> to vector<8x32xf32>
    %379 = arith.mulf %378, %328 : vector<8x32xf32>
    %380 = arith.addf %377, %379 : vector<8x32xf32>
    %381 = vector.extract_strided_slice %357 {offsets = [0, 0], sizes = [8, 64], strides = [1, 1]} : vector<8x96xf32> to vector<8x64xf32>
    %382 = vector.extract_strided_slice %358 {offsets = [0, 0], sizes = [8, 64], strides = [1, 1]} : vector<8x96xf32> to vector<8x64xf32>
    %383 = arith.addf %381, %382 : vector<8x64xf32>
    %384 = arith.negf %383 : vector<8x64xf32>
    %385 = math.exp %384 : vector<8x64xf32>
    %cst_54 = arith.constant 1.000000e+00 : f32
    %386 = vector.broadcast %cst_54 : f32 to vector<8x64xf32>
    %387 = arith.addf %386, %385 : vector<8x64xf32>
    %388 = arith.divf %386, %387 : vector<8x64xf32>
    %389 = vector.extract_strided_slice %357 {offsets = [0, 64], sizes = [8, 32], strides = [1, 1]} : vector<8x96xf32> to vector<8x32xf32>
    %390 = vector.extract_strided_slice %388 {offsets = [0, 0], sizes = [8, 32], strides = [1, 1]} : vector<8x64xf32> to vector<8x32xf32>
    %391 = vector.extract_strided_slice %358 {offsets = [0, 64], sizes = [8, 32], strides = [1, 1]} : vector<8x96xf32> to vector<8x32xf32>
    %392 = arith.mulf %390, %391 : vector<8x32xf32>
    %393 = arith.addf %389, %392 : vector<8x32xf32>
    %394 = math.tanh %393 : vector<8x32xf32>
    %395 = vector.extract_strided_slice %388 {offsets = [0, 32], sizes = [8, 32], strides = [1, 1]} : vector<8x64xf32> to vector<8x32xf32>
    %cst_55 = arith.constant 1.000000e+00 : f32
    %396 = vector.broadcast %cst_55 : f32 to vector<8x32xf32>
    %397 = arith.subf %396, %395 : vector<8x32xf32>
    %398 = arith.mulf %397, %394 : vector<8x32xf32>
    %399 = vector.extract_strided_slice %388 {offsets = [0, 32], sizes = [8, 32], strides = [1, 1]} : vector<8x64xf32> to vector<8x32xf32>
    %400 = arith.mulf %399, %349 : vector<8x32xf32>
    %401 = arith.addf %398, %400 : vector<8x32xf32>
    %c48 = arith.constant 48 : index
    %c0_56 = arith.constant 0 : index
    %402 = vector.load %arg8[%c48, %c0_56] : memref<64x32xf32, #tpu.memory_space<vmem>>, vector<8x32xf32>
    tpu.vector_store %arg8[%c48, %c0_56], %401 {strides = array<i32>} : memref<64x32xf32, #tpu.memory_space<vmem>>, vector<8x32xf32>,
    %403 = tpu.concatenate %380, %401 in 1 : vector<8x32xf32>, vector<8x32xf32> -> vector<8x64xf32>
    %404 = arith.truncf %403 : vector<8x64xf32> to vector<8x64xbf16>
    %cst_57 = arith.constant dense<0.000000e+00> : vector<8x384xf32>
    %405 = tpu.matmul %404, %7, %cst_57 {dimension_numbers = #tpu.dot_dimension_numbers<[1], [0], [0], [1], [0, 0, 1, 1], [], []>} : vector<8x64xbf16>, vector<64x384xbf16>, vector<8x384xf32> -> vector<8x384xf32>
    %406 = vector.broadcast %8 : vector<1x384xf32> to vector<8x384xf32>
    %407 = arith.addf %405, %406 : vector<8x384xf32>
    %408 = vector.extract_strided_slice %407 {offsets = [0, 128], sizes = [8, 96], strides = [1, 1]} : vector<8x384xf32> to vector<8x96xf32>
    %409 = vector.extract_strided_slice %407 {offsets = [0, 256], sizes = [8, 96], strides = [1, 1]} : vector<8x384xf32> to vector<8x96xf32>
    %410 = vector.extract_strided_slice %408 {offsets = [0, 0], sizes = [8, 64], strides = [1, 1]} : vector<8x96xf32> to vector<8x64xf32>
    %411 = vector.extract_strided_slice %409 {offsets = [0, 0], sizes = [8, 64], strides = [1, 1]} : vector<8x96xf32> to vector<8x64xf32>
    %412 = arith.addf %410, %411 : vector<8x64xf32>
    %413 = arith.negf %412 : vector<8x64xf32>
    %414 = math.exp %413 : vector<8x64xf32>
    %cst_58 = arith.constant 1.000000e+00 : f32
    %415 = vector.broadcast %cst_58 : f32 to vector<8x64xf32>
    %416 = arith.addf %415, %414 : vector<8x64xf32>
    %417 = arith.divf %415, %416 : vector<8x64xf32>
    %418 = vector.extract_strided_slice %408 {offsets = [0, 64], sizes = [8, 32], strides = [1, 1]} : vector<8x96xf32> to vector<8x32xf32>
    %419 = vector.extract_strided_slice %417 {offsets = [0, 0], sizes = [8, 32], strides = [1, 1]} : vector<8x64xf32> to vector<8x32xf32>
    %420 = vector.extract_strided_slice %409 {offsets = [0, 64], sizes = [8, 32], strides = [1, 1]} : vector<8x96xf32> to vector<8x32xf32>
    %421 = arith.mulf %419, %420 : vector<8x32xf32>
    %422 = arith.addf %418, %421 : vector<8x32xf32>
    %423 = math.tanh %422 : vector<8x32xf32>
    %424 = vector.extract_strided_slice %417 {offsets = [0, 32], sizes = [8, 32], strides = [1, 1]} : vector<8x64xf32> to vector<8x32xf32>
    %cst_59 = arith.constant 1.000000e+00 : f32
    %425 = vector.broadcast %cst_59 : f32 to vector<8x32xf32>
    %426 = arith.subf %425, %424 : vector<8x32xf32>
    %427 = arith.mulf %426, %423 : vector<8x32xf32>
    %428 = vector.extract_strided_slice %417 {offsets = [0, 32], sizes = [8, 32], strides = [1, 1]} : vector<8x64xf32> to vector<8x32xf32>
    %429 = arith.mulf %428, %401 : vector<8x32xf32>
    %430 = arith.addf %427, %429 : vector<8x32xf32>
    %c56 = arith.constant 56 : index
    %c0_60 = arith.constant 0 : index
    %431 = vector.load %arg8[%c56, %c0_60] : memref<64x32xf32, #tpu.memory_space<vmem>>, vector<8x32xf32>
    tpu.vector_store %arg8[%c56, %c0_60], %430 {strides = array<i32>} : memref<64x32xf32, #tpu.memory_space<vmem>>, vector<8x32xf32>,
    %c0_61 = arith.constant 0 : index
    %c0_62 = arith.constant 0 : index
    %432 = vector.load %arg8[%c0_61, %c0_62] : memref<64x32xf32, #tpu.memory_space<vmem>>, vector<64x32xf32>
    %433 = arith.truncf %432 : vector<64x32xf32> to vector<64x32xbf16>
    %c0_63 = arith.constant 0 : index
    %c0_64 = arith.constant 0 : index
    %434 = vector.load %arg5[%c0_63, %c0_64] : memref<32x128xbf16, #tpu.memory_space<vmem>>, vector<32x128xbf16>
    %cst_65 = arith.constant dense<0.000000e+00> : vector<64x128xf32>
    %435 = tpu.matmul %433, %434, %cst_65 {dimension_numbers = #tpu.dot_dimension_numbers<[1], [0], [0], [1], [0, 0, 1, 1], [], []>} : vector<64x32xbf16>, vector<32x128xbf16>, vector<64x128xf32> -> vector<64x128xf32>
    %c0_66 = arith.constant 0 : index
    %c0_67 = arith.constant 0 : index
    %436 = vector.load %arg6[%c0_66, %c0_67] : memref<1x128xf32, #tpu.memory_space<vmem>>, vector<1x128xf32>
    %437 = vector.broadcast %436 : vector<1x128xf32> to vector<64x128xf32>
    %438 = arith.addf %435, %437 : vector<64x128xf32>
    %439 = math.tanh %438 : vector<64x128xf32>
    %440 = vector.extract_strided_slice %439 {offsets = [0, 0], sizes = [64, 4], strides = [1, 1]} : vector<64x128xf32> to vector<64x4xf32>
    %441 = vector.extract_strided_slice %439 {offsets = [0, 4], sizes = [64, 4], strides = [1, 1]} : vector<64x128xf32> to vector<64x4xf32>
    %442 = vector.extract_strided_slice %439 {offsets = [0, 8], sizes = [64, 4], strides = [1, 1]} : vector<64x128xf32> to vector<64x4xf32>
    %443 = arith.mulf %440, %440 : vector<64x4xf32>
    %444 = arith.mulf %441, %441 : vector<64x4xf32>
    %445 = arith.addf %443, %444 : vector<64x4xf32>
    %446 = arith.mulf %442, %442 : vector<64x4xf32>
    %447 = arith.addf %445, %446 : vector<64x4xf32>
    %cst_68 = arith.constant 9.99999996E-13 : f32
    %448 = vector.broadcast %cst_68 : f32 to vector<64x4xf32>
    %449 = arith.addf %447, %448 : vector<64x4xf32>
    %450 = math.rsqrt %449 : vector<64x4xf32>
    %cst_69 = arith.constant 0.000000e+00 : f32
    %451 = vector.broadcast %cst_69 : f32 to vector<64x116xf32>
    %452 = arith.mulf %440, %450 : vector<64x4xf32>
    %453 = arith.mulf %441, %450 : vector<64x4xf32>
    %454 = arith.mulf %442, %450 : vector<64x4xf32>
    %455 = tpu.concatenate %452, %453, %454, %451 in 1 : vector<64x4xf32>, vector<64x4xf32>, vector<64x4xf32>, vector<64x116xf32> -> vector<64x128xf32>
    %c0_70 = arith.constant 0 : index
    %c0_71 = arith.constant 0 : index
    %456 = vector.load %arg7[%c0_70, %c0_71] : memref<64x128xf32, #tpu.memory_space<vmem>>, vector<64x128xf32>
    tpu.vector_store %arg7[%c0_70, %c0_71], %455 {strides = array<i32>} : memref<64x128xf32, #tpu.memory_space<vmem>>, vector<64x128xf32>,
    return
  }
}

</mosaic_0001>

<bundles_post_ra>
// kernel: mdn_forward.1
= control target key start
LH: loop header
LB: loop body
LE: loop exit
PB: predicated region body
PF: predicated region fallthrough
CT: control target
= control target key end

     0   :  { %v2180_v1 = vmov 0   ;;  %vm54_vm0 = vcmask 130048   ;;  %v2181_v16 = vmov 0.0|0.0   ;;  %v151_v17 = vlaneseq  ;;  %s2182_s28 = smov 64   ;;  %s2184_s20 = smov 96   ;;  %s2921_s3 = inlined_call_operand.vmem [shape: bf16[64,384], index: 3, kind: input, shape index: {}]   ;;  %s2922_s1 = inlined_call_operand.vmem [shape: bf16[16,128], index: 1, kind: input, shape index: {}]   ;;  %s2923_s0 = inlined_call_operand.vmem [shape: f32[64,16], index: 0, kind: input, shape index: {}]   ;;  %s2924_s4 = inlined_call_operand.vmem [shape: f32[1,384], index: 4, kind: input, shape index: {}]   ;;  %s2925_s2 = inlined_call_operand.vmem [shape: f32[1,128], index: 2, kind: input, shape index: {}]   ;;  %s2926_s5 = inlined_call_operand.vmem [shape: bf16[32,128], index: 5, kind: input, shape index: {}]   ;;  %s2927_s6 = inlined_call_operand.vmem [shape: f32[1,128], index: 6, kind: input, shape index: {}]   ;;  %s2928_s7 = inlined_call_operand.vmem [shape: f32[64,128], index: 7, kind: output, shape index: {}]  }
   0x1   :  { %v2233_v0 = vld [vmem:[%s2921_s3 + $0x4c] ss:$12 sps:$4 sm:$0xff]   ;;  %242 = vmatprep.mubr.bf16.mxu1 %v2180_v1  ;;  %v2239_v2 = vld [vmem:[%s2921_s3 + $0x48] ss:$12 sps:$4 sm:$0xff]   ;;  %v2251_v4 = vld [vmem:[%s2921_s3 + $0x30] ss:$12 sps:$4 sm:$0xff]  }
   0x2   :  { %218 = vmatprep.subr.bf16.mxu1 %v2233_v0  ;;  %v2245_v3 = vld [vmem:[%s2921_s3 + $0x34] ss:$12 sps:$4 sm:$0xff]   ;;  %v2256_v5 = vld [vmem:[%s2921_s3 + $0x1c] ss:$12 sps:$4 sm:$0xff]   ;;  %v2265_v7 = vld [vmem:[%s2921_s3 + $0x18] ss:$12 sps:$4 sm:$0xff]  }
   0x3   :  { %219 = vmatpush1.bf16.msra.mxu1 %v2239_v2  ;;  %v2030_v6 = vld [vmem:[%s2922_s1] sm:$0xff]   ;;  %v28_v10 = vld [vmem:[%s2923_s0 + $0x8] sm:$0xff]  ;;  %v29_v12 = vld [vmem:[%s2923_s0 + $0x10] sm:$0xff]  ;;  %v2305_v18 = vshrl.u32 %v151_v17, 7  ;;  %v2183_v43 = vmov 0.0   ;;  %vm2185_vm1 = vmmov 0  }
   0x4   :  { %220 = vmatprep.subr.bf16.mxu1 %v2245_v3  ;;  %1893 = vmatprep.subr.bf16.mxu0 %v2030_v6  ;;  %v2270_v8 = vld [vmem:[%s2921_s3 + $0x4] ss:$12 sps:$4 sm:$0xff]   ;;  %v30_v13 = vld [vmem:[%s2923_s0 + $0x18] sm:$0xff]  ;;  %v2293_v15 = vld [vmem:[%s2921_s3] ss:$12 sps:$4 sm:$0xff]   ;;  %vm280_vm2 = vcmask 261120  }
   0x5   :  { %v27_v9 = vld [vmem:[%s2923_s0] sm:$0xff]  ;;  %1894 = vmatpush3.bf16.msra.mxu0 %v2030_v6  ;;  %v36_v14 = vpack.c.bf16 %v30_v13, %v29_v12  ;;  %v153_v19 = vsub.s32 0, %v2305_v18  ;;  %v32_v41 = vld [vmem:[%s2923_s0 + $0x28] sm:$0xff]  ;;  %v2336_v42 = vld [vmem:[%s2921_s3 + $0x50] ss:$12 sps:$4 sm:$0xff]   ;;  %vm206_vm3 = vcmask 523264  }
   0x6   :  { %v35_v11 = vpack.c.bf16 %v28_v10, %v27_v9  ;;  %318 = vmatprep.subr.bf16.mxu0 %v2233_v0  ;;  %v2311_v20 = vld [vmem:[%s2924_s4] sm:$0x7]  ;;  %v33_v45 = vld [vmem:[%s2923_s0 + $0x30] sm:$0xff]  ;;  %v34_v46 = vld [vmem:[%s2923_s0 + $0x38] sm:$0xff]  ;;  %v161_v6 = vsub.s32 2, %v2305_v18  ;;  %s2186_s23 = smov 124  }
   0x7   :  { %221 = vmatpush1.bf16.msra.mxu1 %v2251_v4  ;;  %v2314_v21 = vrot.slane %v2311_v20, %v153_v19  ;;  %v2323_v28 = vld [vmem:[%s2925_s2] ss:$0 sm:$0xff]  ;;  %v38_v47 = vpack.c.bf16 %v34_v46, %v33_v45  ;;  %v2349_v48 = vld [vmem:[%s2921_s3 + $0x38] ss:$12 sps:$4 sm:$0xff]   ;;  %v2368_v51 = vld [vmem:[%s2921_s3 + $0x8] ss:$12 sps:$4 sm:$0xff]  }
   0x8   :  { %222 = vmatprep.subr.bf16.mxu1 %v2256_v5  ;;  %1895 = vmatprep.mubr.msk.bf16.mxu0 %vm54_vm0, %v35_v11  ;;  %v31_v40 = vld [vmem:[%s2923_s0 + $0x20] sm:$0xff]  ;;  %v2410_v10 = vrot.slane %v2311_v20, %v161_v6  ;;  %s2188_s24 = smov 4   ;;  %s2189_s25 = smov 8   ;;  %vm1746_vm4 = vcmask 31744   ;;  %vm1755_vm5 = vcmask 64512   ;;  %vm1764_vm6 = vcmask 97280  }
   0x9   :  { %1896 = vmatmul.mubr.msk.bf16.vlgmr.msra.gmra.mxu0 %vm54_vm0, %v36_v14  ;;  %v37_v44 = vpack.c.bf16 %v32_v41, %v31_v40  ;;  %v2359_v49 = vld [vmem:[%s2921_s3 + $0x20] ss:$12 sps:$4 sm:$0xff]  }
   0xa   :  { %319 = vmatpush1.bf16.msra.mxu0 %v2239_v2 }
   0xb   :  { %223 = vmatpush1.bf16.msra.mxu1 %v2265_v7  ;;  %320 = vmatprep.subr.bf16.mxu0 %v2245_v3 }
   0xc   :  { %224 = vmatprep.subr.bf16.mxu1 %v2270_v8  ;;  %1899 = vmatprep.mubr.msk.bf16.mxu0 %vm54_vm0, %v37_v44 }
   0xe   :  { %321 = vmatpush1.bf16.msra.mxu0 %v2251_v4 }
   0xf   :  { %225 = vmatpush1.bf16.msra.mxu1 %v2293_v15  ;;  %322 = vmatprep.subr.bf16.mxu0 %v2256_v5 }
  0x10   :  { %1903 = vmatprep.subr.bf16.mxu1 %v2183_v43 }
  0x11   :  { %1900 = vmatmul.mubr.msk.bf16.gmra.mxu0 %vm54_vm0, %v38_v47 }
  0x12   :  { %243 = vmatmul.mubr.bf16.vlgmr.msra.gmra.mxu1 %v2181_v16  ;;  %323 = vmatpush1.bf16.msra.mxu0 %v2265_v7 }
  0x13   :  { %324 = vmatprep.subr.bf16.mxu0 %v2270_v8  ;;  %1904 = vmatpush3.bf16.msra.mxu1 %v2336_v42 }
  0x14   :  { %1905 = vmatprep.subr.bf16.mxu1 %v2183_v43  ;;  %342 = vmatprep.mubr.bf16.mxu0 %v2180_v1 }
  0x15   :  { %1911 = vmatprep.mubr.msk.bf16.mxu1 %vm2185_vm1, %v2183_v43 }
  0x16   :  { %325 = vmatpush1.bf16.msra.mxu0 %v2293_v15 }
  0x17   :  { %465 = vmatprep.subr.bf16.mxu0 %v2233_v0  ;;  %1906 = vmatpush3.bf16.msra.mxu1 %v2349_v48 }
  0x18   :  { %1907 = vmatprep.subr.bf16.mxu1 %v2183_v43 }
  0x1b   :  { %1908 = vmatpush3.bf16.msra.mxu1 %v2359_v49 }
  0x1c   :  { %1909 = vmatprep.subr.bf16.mxu1 %v2183_v43 }
  0x1f   :  { %1910 = vmatpush3.bf16.msra.mxu1 %v2368_v51 }
  0x20   :  { %1915 = vmatprep.subr.bf16.mxu1 %v2183_v43 }
  0xc9   :  { %v2318_v27 = vpop.f32.mrf.mxu0 }
  0xcb   :  { %v101_v29 = vpop.f32.mrf.mxu0 }
  0xcc   :  { %v102_v30 = vadd.f32 %v2323_v28, %v101_v29 }
  0xcd   :  { %v2400_v60 = vpop.f32.mrf.mxu0 }
  0xcf   :  { %v104_v61 = vpop.f32.mrf.mxu0 }
  0xd1   :  { %v2402_v62 = vpop.f32.mrf.mxu0 }
  0xd2   :  { %v244_v22 = vpop.f32.mrf.mxu1 }
  0xd3   :  { %v245_v23 = vadd.f32 %v244_v22, %v2314_v21  ;;  %v2404_v63 = vpop.f32.mrf.mxu0 }
  0xd4   :  { %v246_v24 = vpop.f32.mrf.mxu1 }
  0xd5   :  { %258 = vrot.lane.b32.xlu0 %v245_v23, %s2182_s28  ;;  %v250_v31 = vadd.f32 %v245_v23, %v102_v30  ;;  %v2407_v9 = vpop.f32.mrf.mxu0 }
  0xd6   :  { %v247_v25 = vpop.f32.mrf.mxu1 }
  0xd7   :  { %v1799_v32 = vmul.f32 -1.442695, %v250_v31  ;;  %v2412_v11 = vpop.f32.mrf.mxu0  ;;  %v105_v31 = vadd.f32 %v2323_v28, %v104_v61 }
  0xd8   :  { %v248_v26 = vpop.f32.mrf.mxu1 }
  0xd9   :  { %2040 = vpow2.f32 %v1799_v32  ;;  %v157_v26 = vsub.s32 1, %v2305_v18 }
  0xdb   :  { %v2420_v29 = vrot.slane %v2311_v20, %v157_v26 }
  0xe6   :  { %v2041_v33 = vpop.eup %2040 }
  0xe7   :  { %v254_v34 = vadd.f32 1.0, %v2041_v33 }
  0xe9   :  { %2042 = vrcp.f32 %v254_v34 }
  0xf6   :  { %v2043_v35 = vpop.eup %2042 }
  0xf7   :  { %v268_v52 = vsub.f32 1.0, %v2043_v35  ;;  %v274_v54 = vmul.f32 0.0, %v2043_v35 }
 0x147   :  { %v259_v36 = vpop.permute.xlu0 %258 }
 0x148   :  { %v261_v37 = vmul.f32 %v2043_v35, %v259_v36 }
 0x14a   :  { %263 = vrot.lane.b32.xlu0 %v261_v37, %s2182_s28 }
 0x1bc   :  { %v264_v38 = vpop.permute.xlu0 %263 }
 0x1bd   :  { %v266_v39 = vadd.f32 %v264_v38, %v102_v30 }
 0x1bf   :  { %2044 = vtanh.f32 %v266_v39 }
 0x1cc   :  { %v2045_v50 = vpop.eup %2044 }
 0x1cd   :  { %270 = vrot.lane.b32.xlu1 %v2045_v50, %s2184_s20 }
 0x23f   :  { %v271_v53 = vpop.permute.xlu1 %270 }
 0x240   :  { %v273_v55 = vmul.f32 %v271_v53, %v268_v52 }
 0x242   :  { %v2374_v56 = vadd.f32 %v274_v54, %v273_v55 }
 0x244   :  { %277 = vrot.lane.b32.xlu1 %v2374_v56, %s2184_s20 }
 0x2b6   :  { %v278_v57 = vpop.permute.xlu1 %277 }
 0x2b7   :  { %v281_v58 = vsel %vm280_vm2, %v278_v57, 0.0 }
 0x2b8   :  { %v282_v59 = vpack.c.bf16 %v281_v58, %v281_v58 }
 0x2ba   :  { %1804 = vmatmul.mubr.msk.bf16.vlgmr.msra.gmra.mxu0 %vm206_vm3, %v282_v59  ;;  %1912 = vmatmul.mubr.msk.bf16.vlgmr.msra.gmra.mxu1 %vm206_vm3, %v282_v59 }
 0x2bb   :  { %466 = vmatpush1.bf16.msra.mxu0 %v2239_v2  ;;  %1916 = vmatpush3.bf16.msra.mxu1 %v2336_v42 }
 0x2bc   :  { %467 = vmatprep.subr.bf16.mxu0 %v2245_v3  ;;  %1917 = vmatprep.subr.bf16.mxu1 %v2183_v43 }
 0x2bd   :  { %489 = vmatprep.mubr.bf16.mxu0 %v2180_v1  ;;  %1923 = vmatprep.mubr.msk.bf16.mxu1 %vm2185_vm1, %v2183_v43 }
 0x2bf   :  { %468 = vmatpush1.bf16.msra.mxu0 %v2251_v4  ;;  %1918 = vmatpush3.bf16.msra.mxu1 %v2349_v48 }
 0x2c0   :  { %469 = vmatprep.subr.bf16.mxu0 %v2256_v5  ;;  %1919 = vmatprep.subr.bf16.mxu1 %v2183_v43 }
 0x2c3   :  { %470 = vmatpush1.bf16.msra.mxu0 %v2265_v7  ;;  %1920 = vmatpush3.bf16.msra.mxu1 %v2359_v49 }
 0x2c4   :  { %471 = vmatprep.subr.bf16.mxu0 %v2270_v8  ;;  %1921 = vmatprep.subr.bf16.mxu1 %v2183_v43 }
 0x2c7   :  { %472 = vmatpush1.bf16.msra.mxu0 %v2293_v15  ;;  %1922 = vmatpush3.bf16.msra.mxu1 %v2368_v51 }
 0x2c8   :  { %612 = vmatprep.subr.bf16.mxu0 %v2233_v0  ;;  %1927 = vmatprep.subr.bf16.mxu1 %v2183_v43 }
 0x37a   :  { %v344_v12 = vpop.f32.mrf.mxu0  ;;  %v385_v13 = vpop.f32.mrf.mxu1 }
 0x37b   :  { %v345_v14 = vadd.f32 %v344_v12, %v2314_v21  ;;  %v386_v16 = vadd.f32 %v385_v13, %v2410_v10 }
 0x37c   :  { %v346_v17 = vpop.f32.mrf.mxu0  ;;  %v1913_v19 = vpop.f32.mrf.mxu1 }
 0x37d   :  { %425 = vrot.lane.b32.xlu1 %v386_v16, %s2182_s28  ;;  %399 = vrot.lane.b32.xlu0 %v345_v14, %s2182_s28  ;;  %v347_v30 = vadd.f32 %v346_v17, %v2420_v29  ;;  %v391_v32 = vadd.f32 %v345_v14, %v105_v31 }
 0x37e   :  { %v348_v22 = vpop.f32.mrf.mxu0  ;;  %v388_v23 = vpop.f32.mrf.mxu1 }
 0x37f   :  { %v417_v33 = vadd.f32 %v386_v16, %v347_v30  ;;  %v1806_v34 = vmul.f32 -1.442695, %v391_v32 }
 0x380   :  { %v349_v24 = vpop.f32.mrf.mxu0  ;;  %v1914_v25 = vpop.f32.mrf.mxu1 }
 0x381   :  { %v1807_v35 = vmul.f32 -1.442695, %v417_v33  ;;  %2046 = vpow2.f32 %v1806_v34 }
 0x383   :  { %2048 = vpow2.f32 %v1807_v35 }
 0x38e   :  { %v2047_v36 = vpop.eup %2046 }
 0x38f   :  { %v395_v38 = vadd.f32 1.0, %v2047_v36  ;;  %v110_v36 = vadd.f32 %v2318_v27, %v2323_v28 }
 0x390   :  { %v2049_v37 = vpop.eup %2048 }
 0x391   :  { %v421_v39 = vadd.f32 1.0, %v2049_v37  ;;  %2050 = vrcp.f32 %v395_v38 }
 0x393   :  { %2052 = vrcp.f32 %v421_v39 }
 0x39e   :  { %v2051_v18 = vpop.eup %2050 }
 0x39f   :  { %v409_v55 = vsub.f32 1.0, %v2051_v18  ;;  %v415_v58 = vmul.f32 %v2051_v18, %v2374_v56 }
 0x3a0   :  { %v2053_v40 = vpop.eup %2052 }
 0x3a1   :  { %v435_v12 = vsub.f32 1.0, %v2053_v40  ;;  %v441_v14 = vmul.f32 0.0, %v2053_v40 }
 0x3ef   :  { %v426_v20 = vpop.permute.xlu1 %425  ;;  %v400_v41 = vpop.permute.xlu0 %399 }
 0x3f0   :  { %v428_v44 = vmul.f32 %v2053_v40, %v426_v20  ;;  %v402_v45 = vmul.f32 %v2051_v18, %v400_v41 }
 0x3f2   :  { %430 = vrot.lane.b32.xlu1 %v428_v44, %s2182_s28  ;;  %404 = vrot.lane.b32.xlu0 %v402_v45, %s2182_s28 }
 0x464   :  { %v431_v46 = vpop.permute.xlu1 %430  ;;  %v405_v47 = vpop.permute.xlu0 %404 }
 0x465   :  { %v433_v50 = vadd.f32 %v431_v46, %v347_v30  ;;  %v407_v52 = vadd.f32 %v405_v47, %v105_v31 }
 0x467   :  { %2054 = vtanh.f32 %v433_v50 }
 0x468   :  { %2056 = vtanh.f32 %v407_v52 }
 0x474   :  { %v2055_v53 = vpop.eup %2054 }
 0x475   :  { %v2057_v54 = vpop.eup %2056  ;;  %437 = vrot.lane.b32.xlu1 %v2055_v53, %s2184_s20 }
 0x476   :  { %411 = vrot.lane.b32.xlu0 %v2057_v54, %s2184_s20 }
 0x4e7   :  { %v438_v6 = vpop.permute.xlu1 %437 }
 0x4e8   :  { %v412_v57 = vpop.permute.xlu0 %411  ;;  %v440_v13 = vmul.f32 %v438_v6, %v435_v12 }
 0x4e9   :  { %v414_v59 = vmul.f32 %v412_v57, %v409_v55 }
 0x4ea   :  { %v2433_v16 = vadd.f32 %v441_v14, %v440_v13 }
 0x4eb   :  { %v2429_v61 = vadd.f32 %v415_v58, %v414_v59 }
 0x4ed   :  { %449 = vrot.lane.b32.xlu0 %v2429_v61, %s2184_s20 }
 0x55f   :  { %v450_v17 = vpop.permute.xlu0 %449 }
 0x560   :  { %v452_v19 = vsel %vm280_vm2, %v450_v17, %v2433_v16 }
 0x561   :  { %v453_v22 = vpack.c.bf16 %v452_v19, %v452_v19 }
 0x563   :  { %1808 = vmatmul.mubr.msk.bf16.vlgmr.msra.gmra.mxu0 %vm206_vm3, %v453_v22  ;;  %1924 = vmatmul.mubr.msk.bf16.vlgmr.msra.gmra.mxu1 %vm206_vm3, %v453_v22 }
 0x564   :  { %613 = vmatpush1.bf16.msra.mxu0 %v2239_v2  ;;  %1928 = vmatpush3.bf16.msra.mxu1 %v2336_v42 }
 0x565   :  { %614 = vmatprep.subr.bf16.mxu0 %v2245_v3  ;;  %1929 = vmatprep.subr.bf16.mxu1 %v2183_v43 }
 0x566   :  { %636 = vmatprep.mubr.bf16.mxu0 %v2180_v1  ;;  %1935 = vmatprep.mubr.msk.bf16.mxu1 %vm2185_vm1, %v2183_v43 }
 0x568   :  { %615 = vmatpush1.bf16.msra.mxu0 %v2251_v4  ;;  %1930 = vmatpush3.bf16.msra.mxu1 %v2349_v48 }
 0x569   :  { %616 = vmatprep.subr.bf16.mxu0 %v2256_v5  ;;  %1931 = vmatprep.subr.bf16.mxu1 %v2183_v43 }
 0x56c   :  { %617 = vmatpush1.bf16.msra.mxu0 %v2265_v7  ;;  %1932 = vmatpush3.bf16.msra.mxu1 %v2359_v49 }
 0x56d   :  { %618 = vmatprep.subr.bf16.mxu0 %v2270_v8  ;;  %1933 = vmatprep.subr.bf16.mxu1 %v2183_v43 }
 0x570   :  { %619 = vmatpush1.bf16.msra.mxu0 %v2293_v15  ;;  %1934 = vmatpush3.bf16.msra.mxu1 %v2368_v51 }
 0x571   :  { %759 = vmatprep.subr.bf16.mxu0 %v2233_v0  ;;  %1939 = vmatprep.subr.bf16.mxu1 %v2183_v43 }
 0x623   :  { %v491_v56 = vpop.f32.mrf.mxu0  ;;  %v532_v23 = vpop.f32.mrf.mxu1 }
 0x624   :  { %v492_v24 = vadd.f32 %v491_v56, %v2314_v21  ;;  %v533_v25 = vadd.f32 %v532_v23, %v2410_v10 }
 0x625   :  { %v493_v26 = vpop.f32.mrf.mxu0  ;;  %v1925_v30 = vpop.f32.mrf.mxu1 }
 0x626   :  { %572 = vrot.lane.b32.xlu0 %v533_v25, %s2182_s28  ;;  %546 = vrot.lane.b32.xlu1 %v492_v24, %s2182_s28  ;;  %v494_v35 = vadd.f32 %v493_v26, %v2420_v29  ;;  %v538_v37 = vadd.f32 %v492_v24, %v110_v36 }
 0x627   :  { %v495_v31 = vpop.f32.mrf.mxu0  ;;  %v535_v32 = vpop.f32.mrf.mxu1 }
 0x628   :  { %v564_v38 = vadd.f32 %v533_v25, %v494_v35  ;;  %v1810_v39 = vmul.f32 -1.442695, %v538_v37 }
 0x629   :  { %v496_v33 = vpop.f32.mrf.mxu0  ;;  %v1926_v34 = vpop.f32.mrf.mxu1 }
 0x62a   :  { %v1811_v18 = vmul.f32 -1.442695, %v564_v38  ;;  %2058 = vpow2.f32 %v1810_v39 }
 0x62c   :  { %2060 = vpow2.f32 %v1811_v18 }
 0x637   :  { %v2059_v40 = vpop.eup %2058 }
 0x638   :  { %v542_v41 = vadd.f32 1.0, %v2059_v40  ;;  %v113_v40 = vadd.f32 %v2400_v60, %v2323_v28 }
 0x639   :  { %v2061_v20 = vpop.eup %2060 }
 0x63a   :  { %v568_v44 = vadd.f32 1.0, %v2061_v20  ;;  %2062 = vrcp.f32 %v542_v41 }
 0x63c   :  { %2064 = vrcp.f32 %v568_v44 }
 0x647   :  { %v2063_v45 = vpop.eup %2062 }
 0x648   :  { %v556_v6 = vsub.f32 1.0, %v2063_v45  ;;  %v562_v13 = vmul.f32 %v2063_v45, %v2429_v61 }
 0x649   :  { %v2065_v46 = vpop.eup %2064 }
 0x64a   :  { %v582_v22 = vsub.f32 1.0, %v2065_v46  ;;  %v588_v23 = vmul.f32 %v2065_v46, %v2433_v16 }
 0x698   :  { %v573_v47 = vpop.permute.xlu0 %572  ;;  %v547_v50 = vpop.permute.xlu1 %546 }
 0x699   :  { %v575_v52 = vmul.f32 %v2065_v46, %v573_v47  ;;  %v549_v53 = vmul.f32 %v2063_v45, %v547_v50 }
 0x69b   :  { %577 = vrot.lane.b32.xlu0 %v575_v52, %s2182_s28  ;;  %551 = vrot.lane.b32.xlu1 %v549_v53, %s2182_s28 }
 0x70d   :  { %v578_v27 = vpop.permute.xlu0 %577  ;;  %v552_v54 = vpop.permute.xlu1 %551 }
 0x70e   :  { %v580_v55 = vadd.f32 %v578_v27, %v494_v35  ;;  %v554_v57 = vadd.f32 %v552_v54, %v110_v36 }
 0x710   :  { %2066 = vtanh.f32 %v580_v55 }
 0x711   :  { %2068 = vtanh.f32 %v554_v57 }
 0x71d   :  { %v2067_v58 = vpop.eup %2066 }
 0x71e   :  { %v2069_v59 = vpop.eup %2068  ;;  %584 = vrot.lane.b32.xlu0 %v2067_v58, %s2184_s20 }
 0x71f   :  { %558 = vrot.lane.b32.xlu1 %v2069_v59, %s2184_s20 }
 0x790   :  { %v585_v19 = vpop.permute.xlu0 %584 }
 0x791   :  { %v559_v12 = vpop.permute.xlu1 %558  ;;  %v587_v56 = vmul.f32 %v585_v19, %v582_v22 }
 0x792   :  { %v561_v14 = vmul.f32 %v559_v12, %v556_v6 }
 0x793   :  { %v2475_v24 = vadd.f32 %v588_v23, %v587_v56 }
 0x794   :  { %v2470_v17 = vadd.f32 %v562_v13, %v561_v14 }
 0x796   :  { %596 = vrot.lane.b32.xlu1 %v2470_v17, %s2184_s20 }
 0x808   :  { %v597_v25 = vpop.permute.xlu1 %596 }
 0x809   :  { %v599_v26 = vsel %vm280_vm2, %v597_v25, %v2475_v24 }
 0x80a   :  { %v600_v30 = vpack.c.bf16 %v599_v26, %v599_v26 }
 0x80c   :  { %1812 = vmatmul.mubr.msk.bf16.vlgmr.msra.gmra.mxu0 %vm206_vm3, %v600_v30  ;;  %1936 = vmatmul.mubr.msk.bf16.vlgmr.msra.gmra.mxu1 %vm206_vm3, %v600_v30 }
 0x80d   :  { %760 = vmatpush1.bf16.msra.mxu0 %v2239_v2  ;;  %1940 = vmatpush3.bf16.msra.mxu1 %v2336_v42 }
 0x80e   :  { %761 = vmatprep.subr.bf16.mxu0 %v2245_v3  ;;  %1941 = vmatprep.subr.bf16.mxu1 %v2183_v43 }
 0x80f   :  { %783 = vmatprep.mubr.bf16.mxu0 %v2180_v1  ;;  %1947 = vmatprep.mubr.msk.bf16.mxu1 %vm2185_vm1, %v2183_v43 }
 0x811   :  { %762 = vmatpush1.bf16.msra.mxu0 %v2251_v4  ;;  %1942 = vmatpush3.bf16.msra.mxu1 %v2349_v48 }
 0x812   :  { %763 = vmatprep.subr.bf16.mxu0 %v2256_v5  ;;  %1943 = vmatprep.subr.bf16.mxu1 %v2183_v43 }
 0x815   :  { %764 = vmatpush1.bf16.msra.mxu0 %v2265_v7  ;;  %1944 = vmatpush3.bf16.msra.mxu1 %v2359_v49 }
 0x816   :  { %765 = vmatprep.subr.bf16.mxu0 %v2270_v8  ;;  %1945 = vmatprep.subr.bf16.mxu1 %v2183_v43 }
 0x819   :  { %766 = vmatpush1.bf16.msra.mxu0 %v2293_v15  ;;  %1946 = vmatpush3.bf16.msra.mxu1 %v2368_v51 }
 0x81a   :  { %906 = vmatprep.subr.bf16.mxu0 %v2233_v0  ;;  %1951 = vmatprep.subr.bf16.mxu1 %v2183_v43 }
 0x8cc   :  { %v638_v61 = vpop.f32.mrf.mxu0  ;;  %v679_v31 = vpop.f32.mrf.mxu1 }
 0x8cd   :  { %v639_v32 = vadd.f32 %v638_v61, %v2314_v21  ;;  %v680_v33 = vadd.f32 %v679_v31, %v2410_v10 }
 0x8ce   :  { %v640_v34 = vpop.f32.mrf.mxu0  ;;  %v1937_v35 = vpop.f32.mrf.mxu1 }
 0x8cf   :  { %719 = vrot.lane.b32.xlu1 %v680_v33, %s2182_s28  ;;  %693 = vrot.lane.b32.xlu0 %v639_v32, %s2182_s28  ;;  %v641_v18 = vadd.f32 %v640_v34, %v2420_v29  ;;  %v685_v20 = vadd.f32 %v639_v32, %v113_v40 }
 0x8d0   :  { %v642_v36 = vpop.f32.mrf.mxu0  ;;  %v682_v37 = vpop.f32.mrf.mxu1 }
 0x8d1   :  { %v711_v41 = vadd.f32 %v680_v33, %v641_v18  ;;  %v1814_v44 = vmul.f32 -1.442695, %v685_v20 }
 0x8d2   :  { %v643_v38 = vpop.f32.mrf.mxu0  ;;  %v1938_v39 = vpop.f32.mrf.mxu1 }
 0x8d3   :  { %v1815_v45 = vmul.f32 -1.442695, %v711_v41  ;;  %2070 = vpow2.f32 %v1814_v44 }
 0x8d5   :  { %2072 = vpow2.f32 %v1815_v45 }
 0x8e0   :  { %v2071_v46 = vpop.eup %2070 }
 0x8e1   :  { %v689_v50 = vadd.f32 1.0, %v2071_v46  ;;  %v118_v46 = vadd.f32 %v2323_v28, %v2404_v63 }
 0x8e2   :  { %v2073_v47 = vpop.eup %2072 }
 0x8e3   :  { %v715_v52 = vadd.f32 1.0, %v2073_v47  ;;  %2074 = vrcp.f32 %v689_v50 }
 0x8e5   :  { %2076 = vrcp.f32 %v715_v52 }
 0x8f0   :  { %v2075_v53 = vpop.eup %2074 }
 0x8f1   :  { %v703_v19 = vsub.f32 1.0, %v2075_v53  ;;  %v709_v56 = vmul.f32 %v2075_v53, %v2470_v17 }
 0x8f2   :  { %v2077_v27 = vpop.eup %2076 }
 0x8f3   :  { %v729_v30 = vsub.f32 1.0, %v2077_v27  ;;  %v735_v31 = vmul.f32 %v2077_v27, %v2475_v24 }
 0x941   :  { %v720_v54 = vpop.permute.xlu1 %719  ;;  %v694_v55 = vpop.permute.xlu0 %693 }
 0x942   :  { %v722_v57 = vmul.f32 %v2077_v27, %v720_v54  ;;  %v696_v58 = vmul.f32 %v2075_v53, %v694_v55 }
 0x944   :  { %724 = vrot.lane.b32.xlu1 %v722_v57, %s2182_s28  ;;  %698 = vrot.lane.b32.xlu0 %v696_v58, %s2182_s28 }
 0x9b6   :  { %v725_v60 = vpop.permute.xlu1 %724  ;;  %v699_v59 = vpop.permute.xlu0 %698 }
 0x9b7   :  { %v727_v6 = vadd.f32 %v725_v60, %v641_v18  ;;  %v701_v12 = vadd.f32 %v699_v59, %v113_v40 }
 0x9b9   :  { %2078 = vtanh.f32 %v727_v6 }
 0x9ba   :  { %2080 = vtanh.f32 %v701_v12 }
 0x9c6   :  { %v2079_v13 = vpop.eup %2078 }
 0x9c7   :  { %v2081_v14 = vpop.eup %2080  ;;  %731 = vrot.lane.b32.xlu1 %v2079_v13, %s2184_s20 }
 0x9c8   :  { %705 = vrot.lane.b32.xlu0 %v2081_v14, %s2184_s20 }
 0xa39   :  { %v732_v26 = vpop.permute.xlu1 %731 }
 0xa3a   :  { %v706_v22 = vpop.permute.xlu0 %705  ;;  %v734_v61 = vmul.f32 %v732_v26, %v729_v30 }
 0xa3b   :  { %v708_v23 = vmul.f32 %v706_v22, %v703_v19 }
 0xa3c   :  { %v2517_v32 = vadd.f32 %v735_v31, %v734_v61 }
 0xa3d   :  { %v2512_v25 = vadd.f32 %v709_v56, %v708_v23 }
 0xa3f   :  { %743 = vrot.lane.b32.xlu0 %v2512_v25, %s2184_s20 }
 0xab1   :  { %v744_v33 = vpop.permute.xlu0 %743 }
 0xab2   :  { %v746_v34 = vsel %vm280_vm2, %v744_v33, %v2517_v32 }
 0xab3   :  { %v747_v35 = vpack.c.bf16 %v746_v34, %v746_v34 }
 0xab5   :  { %1816 = vmatmul.mubr.msk.bf16.vlgmr.msra.gmra.mxu0 %vm206_vm3, %v747_v35  ;;  %1948 = vmatmul.mubr.msk.bf16.vlgmr.msra.gmra.mxu1 %vm206_vm3, %v747_v35 }
 0xab6   :  { %907 = vmatpush1.bf16.msra.mxu0 %v2239_v2  ;;  %1952 = vmatpush3.bf16.msra.mxu1 %v2336_v42 }
 0xab7   :  { %908 = vmatprep.subr.bf16.mxu0 %v2245_v3  ;;  %1953 = vmatprep.subr.bf16.mxu1 %v2183_v43 }
 0xab8   :  { %930 = vmatprep.mubr.bf16.mxu0 %v2180_v1  ;;  %1959 = vmatprep.mubr.msk.bf16.mxu1 %vm2185_vm1, %v2183_v43 }
 0xaba   :  { %909 = vmatpush1.bf16.msra.mxu0 %v2251_v4  ;;  %1954 = vmatpush3.bf16.msra.mxu1 %v2349_v48 }
 0xabb   :  { %910 = vmatprep.subr.bf16.mxu0 %v2256_v5  ;;  %1955 = vmatprep.subr.bf16.mxu1 %v2183_v43 }
 0xabe   :  { %911 = vmatpush1.bf16.msra.mxu0 %v2265_v7  ;;  %1956 = vmatpush3.bf16.msra.mxu1 %v2359_v49 }
 0xabf   :  { %912 = vmatprep.subr.bf16.mxu0 %v2270_v8  ;;  %1957 = vmatprep.subr.bf16.mxu1 %v2183_v43 }
 0xac2   :  { %913 = vmatpush1.bf16.msra.mxu0 %v2293_v15  ;;  %1958 = vmatpush3.bf16.msra.mxu1 %v2368_v51 }
 0xac3   :  { %1053 = vmatprep.subr.bf16.mxu0 %v2233_v0  ;;  %1963 = vmatprep.subr.bf16.mxu1 %v2183_v43 }
 0xb75   :  { %v785_v17 = vpop.f32.mrf.mxu0  ;;  %v826_v36 = vpop.f32.mrf.mxu1 }
 0xb76   :  { %v786_v37 = vadd.f32 %v785_v17, %v2314_v21  ;;  %v827_v38 = vadd.f32 %v826_v36, %v2410_v10 }
 0xb77   :  { %v787_v39 = vpop.f32.mrf.mxu0  ;;  %v1949_v18 = vpop.f32.mrf.mxu1 }
 0xb78   :  { %866 = vrot.lane.b32.xlu0 %v827_v38, %s2182_s28  ;;  %840 = vrot.lane.b32.xlu1 %v786_v37, %s2182_s28  ;;  %v788_v45 = vadd.f32 %v787_v39, %v2420_v29  ;;  %v832_v47 = vadd.f32 %v786_v37, %v118_v46 }
 0xb79   :  { %v789_v40 = vpop.f32.mrf.mxu0  ;;  %v829_v20 = vpop.f32.mrf.mxu1 }
 0xb7a   :  { %v858_v50 = vadd.f32 %v827_v38, %v788_v45  ;;  %v1818_v52 = vmul.f32 -1.442695, %v832_v47 }
 0xb7b   :  { %v790_v41 = vpop.f32.mrf.mxu0  ;;  %v1950_v44 = vpop.f32.mrf.mxu1 }
 0xb7c   :  { %v1819_v53 = vmul.f32 -1.442695, %v858_v50  ;;  %2082 = vpow2.f32 %v1818_v52  ;;  %v121_v44 = vadd.f32 %v2323_v28, %v2412_v11 }
 0xb7e   :  { %2084 = vpow2.f32 %v1819_v53 }
 0xb89   :  { %v2083_v27 = vpop.eup %2082 }
 0xb8a   :  { %v836_v55 = vadd.f32 1.0, %v2083_v27 }
 0xb8b   :  { %v2085_v54 = vpop.eup %2084 }
 0xb8c   :  { %v862_v57 = vadd.f32 1.0, %v2085_v54  ;;  %2086 = vrcp.f32 %v836_v55 }
 0xb8e   :  { %2088 = vrcp.f32 %v862_v57 }
 0xb99   :  { %v2087_v58 = vpop.eup %2086 }
 0xb9a   :  { %v850_v26 = vsub.f32 1.0, %v2087_v58  ;;  %v856_v61 = vmul.f32 %v2087_v58, %v2512_v25 }
 0xb9b   :  { %v2089_v60 = vpop.eup %2088 }
 0xb9c   :  { %v876_v35 = vsub.f32 1.0, %v2089_v60  ;;  %v882_v36 = vmul.f32 %v2089_v60, %v2517_v32 }
 0xbea   :  { %v867_v59 = vpop.permute.xlu0 %866  ;;  %v841_v6 = vpop.permute.xlu1 %840 }
 0xbeb   :  { %v869_v12 = vmul.f32 %v2089_v60, %v867_v59  ;;  %v843_v13 = vmul.f32 %v2087_v58, %v841_v6 }
 0xbed   :  { %871 = vrot.lane.b32.xlu0 %v869_v12, %s2182_s28  ;;  %845 = vrot.lane.b32.xlu1 %v843_v13, %s2182_s28 }
 0xc5f   :  { %v872_v63 = vpop.permute.xlu0 %871  ;;  %v846_v14 = vpop.permute.xlu1 %845 }
 0xc60   :  { %v874_v19 = vadd.f32 %v872_v63, %v788_v45  ;;  %v848_v22 = vadd.f32 %v846_v14, %v118_v46 }
 0xc62   :  { %2090 = vtanh.f32 %v874_v19 }
 0xc63   :  { %2092 = vtanh.f32 %v848_v22 }
 0xc6f   :  { %v2091_v56 = vpop.eup %2090 }
 0xc70   :  { %v2093_v23 = vpop.eup %2092  ;;  %878 = vrot.lane.b32.xlu0 %v2091_v56, %s2184_s20 }
 0xc71   :  { %852 = vrot.lane.b32.xlu1 %v2093_v23, %s2184_s20 }
 0xce2   :  { %v879_v34 = vpop.permute.xlu0 %878 }
 0xce3   :  { %v853_v30 = vpop.permute.xlu1 %852  ;;  %v881_v17 = vmul.f32 %v879_v34, %v876_v35 }
 0xce4   :  { %v855_v31 = vmul.f32 %v853_v30, %v850_v26 }
 0xce5   :  { %v2559_v37 = vadd.f32 %v882_v36, %v881_v17 }
 0xce6   :  { %v2554_v33 = vadd.f32 %v856_v61, %v855_v31 }
 0xce8   :  { %890 = vrot.lane.b32.xlu1 %v2554_v33, %s2184_s20 }
 0xd5a   :  { %v891_v38 = vpop.permute.xlu1 %890 }
 0xd5b   :  { %v893_v39 = vsel %vm280_vm2, %v891_v38, %v2559_v37 }
 0xd5c   :  { %v894_v18 = vpack.c.bf16 %v893_v39, %v893_v39 }
 0xd5e   :  { %1820 = vmatmul.mubr.msk.bf16.vlgmr.msra.gmra.mxu0 %vm206_vm3, %v894_v18  ;;  %1960 = vmatmul.mubr.msk.bf16.vlgmr.msra.gmra.mxu1 %vm206_vm3, %v894_v18  ;;  %v2617_v18 = vld [vmem:[%s2921_s3 + $0x34] ss:$12 sps:$4 sm:$0xff]  }
 0xd5f   :  { %1054 = vmatpush1.bf16.msra.mxu0 %v2239_v2  ;;  %1964 = vmatpush3.bf16.msra.mxu1 %v2336_v42 }
 0xd60   :  { %1055 = vmatprep.subr.bf16.mxu0 %v2245_v3  ;;  %1965 = vmatprep.subr.bf16.mxu1 %v2183_v43 }
 0xd61   :  { %1077 = vmatprep.mubr.bf16.mxu0 %v2180_v1  ;;  %1971 = vmatprep.mubr.msk.bf16.mxu1 %vm2185_vm1, %v2183_v43 }
 0xd63   :  { %1056 = vmatpush1.bf16.msra.mxu0 %v2251_v4  ;;  %1966 = vmatpush3.bf16.msra.mxu1 %v2349_v48 }
 0xd64   :  { %1057 = vmatprep.subr.bf16.mxu0 %v2256_v5  ;;  %1967 = vmatprep.subr.bf16.mxu1 %v2183_v43 }
 0xd67   :  { %1058 = vmatpush1.bf16.msra.mxu0 %v2265_v7  ;;  %1968 = vmatpush3.bf16.msra.mxu1 %v2359_v49 }
 0xd68   :  { %1059 = vmatprep.subr.bf16.mxu0 %v2270_v8  ;;  %1969 = vmatprep.subr.bf16.mxu1 %v2183_v43 }
 0xd6b   :  { %1060 = vmatpush1.bf16.msra.mxu0 %v2293_v15  ;;  %1970 = vmatpush3.bf16.msra.mxu1 %v2368_v51 }
 0xd6c   :  { %1200 = vmatprep.subr.bf16.mxu0 %v2233_v0  ;;  %1975 = vmatprep.subr.bf16.mxu1 %v2183_v43 }
 0xe1e   :  { %v932_v2 = vpop.f32.mrf.mxu0  ;;  %v973_v3 = vpop.f32.mrf.mxu1 }
 0xe1f   :  { %v933_v4 = vadd.f32 %v932_v2, %v2314_v21  ;;  %v974_v5 = vadd.f32 %v973_v3, %v2410_v10  ;;  %v2627_v2 = vld [vmem:[%s2921_s3 + $0x30] ss:$12 sps:$4 sm:$0xff]   ;;  %v2641_v3 = vld [vmem:[%s2921_s3 + $0x18] ss:$12 sps:$4 sm:$0xff]  }
 0xe20   :  { %v934_v7 = vpop.f32.mrf.mxu0  ;;  %v1961_v25 = vpop.f32.mrf.mxu1 }
 0xe21   :  { %1013 = vrot.lane.b32.xlu1 %v974_v5, %s2182_s28  ;;  %987 = vrot.lane.b32.xlu0 %v933_v4, %s2182_s28  ;;  %v935_v0 = vadd.f32 %v934_v7, %v2420_v29  ;;  %v979_v45 = vadd.f32 %v933_v4, %v121_v44  ;;  %v2174_v4 = vld [vmem:[%s2921_s3 + $0x4c] ss:$12 sps:$4 sm:$0xff]  }
 0xe22   :  { %v936_v8 = vpop.f32.mrf.mxu0  ;;  %v976_v40 = vpop.f32.mrf.mxu1 }
 0xe23   :  { %v1005_v46 = vadd.f32 %v974_v5, %v935_v0  ;;  %v1822_v47 = vmul.f32 -1.442695, %v979_v45  ;;  %v126_v45 = vadd.f32 %v2402_v62, %v2323_v28 }
 0xe24   :  { %v937_v20 = vpop.f32.mrf.mxu0  ;;  %v1962_v41 = vpop.f32.mrf.mxu1 }
 0xe25   :  { %v1823_v50 = vmul.f32 -1.442695, %v1005_v46  ;;  %2094 = vpow2.f32 %v1822_v47 }
 0xe27   :  { %2096 = vpow2.f32 %v1823_v50 }
 0xe32   :  { %v2095_v52 = vpop.eup %2094 }
 0xe33   :  { %v983_v27 = vadd.f32 1.0, %v2095_v52 }
 0xe34   :  { %v2097_v53 = vpop.eup %2096 }
 0xe35   :  { %v1009_v54 = vadd.f32 1.0, %v2097_v53  ;;  %2098 = vrcp.f32 %v983_v27 }
 0xe37   :  { %2100 = vrcp.f32 %v1009_v54 }
 0xe42   :  { %v2099_v55 = vpop.eup %2098 }
 0xe43   :  { %v997_v22 = vsub.f32 1.0, %v2099_v55  ;;  %v1003_v23 = vmul.f32 %v2099_v55, %v2554_v33  ;;  %v2610_v33 = vld [vmem:[%s2921_s3 + $0x48] ss:$12 sps:$4 sm:$0xff]  }
 0xe44   :  { %v2101_v57 = vpop.eup %2100 }
 0xe45   :  { %v1023_v31 = vsub.f32 1.0, %v2101_v57  ;;  %v1029_v35 = vmul.f32 %v2101_v57, %v2559_v37 }
 0xe93   :  { %v1014_v58 = vpop.permute.xlu1 %1013  ;;  %v988_v60 = vpop.permute.xlu0 %987 }
 0xe94   :  { %v1016_v59 = vmul.f32 %v2101_v57, %v1014_v58  ;;  %v990_v6 = vmul.f32 %v2099_v55, %v988_v60 }
 0xe96   :  { %1018 = vrot.lane.b32.xlu1 %v1016_v59, %s2182_s28  ;;  %992 = vrot.lane.b32.xlu0 %v990_v6, %s2182_s28 }
 0xf08   :  { %v1019_v11 = vpop.permute.xlu1 %1018  ;;  %v993_v12 = vpop.permute.xlu0 %992 }
 0xf09   :  { %v1021_v13 = vadd.f32 %v1019_v11, %v935_v0  ;;  %v995_v63 = vadd.f32 %v993_v12, %v121_v44 }
 0xf0b   :  { %2102 = vtanh.f32 %v1021_v13 }
 0xf0c   :  { %2104 = vtanh.f32 %v995_v63 }
 0xf18   :  { %v2103_v14 = vpop.eup %2102 }
 0xf19   :  { %v2105_v19 = vpop.eup %2104  ;;  %1025 = vrot.lane.b32.xlu1 %v2103_v14, %s2184_s20 }
 0xf1a   :  { %999 = vrot.lane.b32.xlu0 %v2105_v19, %s2184_s20 }
 0xf8b   :  { %v1026_v61 = vpop.permute.xlu1 %1025 }
 0xf8c   :  { %v1000_v56 = vpop.permute.xlu0 %999  ;;  %v1028_v34 = vmul.f32 %v1026_v61, %v1023_v31 }
 0xf8d   :  { %v1002_v26 = vmul.f32 %v1000_v56, %v997_v22 }
 0xf8e   :  { %v2601_v17 = vadd.f32 %v1029_v35, %v1028_v34 }
 0xf8f   :  { %v2596_v30 = vadd.f32 %v1003_v23, %v1002_v26 }
 0xf91   :  { %1037 = vrot.lane.b32.xlu0 %v2596_v30, %s2184_s20 }
0x1003   :  { %v1038_v36 = vpop.permute.xlu0 %1037 }
0x1004   :  { %v1040_v38 = vsel %vm280_vm2, %v1038_v36, %v2601_v17 }
0x1005   :  { %v1041_v39 = vpack.c.bf16 %v1040_v38, %v1040_v38 }
0x1007   :  { %1824 = vmatmul.mubr.msk.bf16.vlgmr.msra.gmra.mxu0 %vm206_vm3, %v1041_v39  ;;  %1972 = vmatmul.mubr.msk.bf16.vlgmr.msra.gmra.mxu1 %vm206_vm3, %v1041_v39 }
0x1008   :  { %1201 = vmatpush1.bf16.msra.mxu0 %v2610_v33  ;;  %1976 = vmatpush3.bf16.msra.mxu1 %v2336_v42  ;;  %v2634_v42 = vld [vmem:[%s2921_s3 + $0x1c] ss:$12 sps:$4 sm:$0xff]  }
0x1009   :  { %1202 = vmatprep.subr.bf16.mxu0 %v2617_v18  ;;  %1977 = vmatprep.subr.bf16.mxu1 %v2183_v43 }
0x100a   :  { %1224 = vmatprep.mubr.bf16.mxu0 %v2180_v1  ;;  %1983 = vmatprep.mubr.msk.bf16.mxu1 %vm2185_vm1, %v2183_v43 }
0x100c   :  { %1203 = vmatpush1.bf16.msra.mxu0 %v2627_v2  ;;  %1978 = vmatpush3.bf16.msra.mxu1 %v2349_v48  ;;  %v2648_v48 = vld [vmem:[%s2921_s3 + $0x4] ss:$12 sps:$4 sm:$0xff]  }
0x100d   :  { %1204 = vmatprep.subr.bf16.mxu0 %v2634_v42  ;;  %1979 = vmatprep.subr.bf16.mxu1 %v2183_v43 }
0x1010   :  { %1205 = vmatpush1.bf16.msra.mxu0 %v2641_v3  ;;  %1980 = vmatpush3.bf16.msra.mxu1 %v2359_v49 }
0x1011   :  { %1206 = vmatprep.subr.bf16.mxu0 %v2648_v48  ;;  %1981 = vmatprep.subr.bf16.mxu1 %v2183_v43 }
0x1014   :  { %1207 = vmatpush1.bf16.msra.mxu0 %v2293_v15  ;;  %1982 = vmatpush3.bf16.msra.mxu1 %v2368_v51 }
0x1015   :  { %1347 = vmatprep.subr.bf16.mxu0 %v2174_v4  ;;  %1987 = vmatprep.subr.bf16.mxu1 %v2183_v43 }
0x10c7   :  { %v1079_v49 = vpop.f32.mrf.mxu0  ;;  %v1120_v5 = vpop.f32.mrf.mxu1 }
0x10c8   :  { %v1080_v7 = vadd.f32 %v1079_v49, %v2314_v21  ;;  %v1121_v25 = vadd.f32 %v1120_v5, %v2410_v10 }
0x10c9   :  { %v1081_v8 = vpop.f32.mrf.mxu0  ;;  %v1973_v40 = vpop.f32.mrf.mxu1 }
0x10ca   :  { %1160 = vrot.lane.b32.xlu0 %v1121_v25, %s2182_s28  ;;  %1134 = vrot.lane.b32.xlu1 %v1080_v7, %s2182_s28  ;;  %v1082_v44 = vadd.f32 %v1081_v8, %v2420_v29  ;;  %v1126_v46 = vadd.f32 %v1080_v7, %v126_v45 }
0x10cb   :  { %v1083_v15 = vpop.f32.mrf.mxu0  ;;  %v1123_v20 = vpop.f32.mrf.mxu1 }
0x10cc   :  { %v1152_v47 = vadd.f32 %v1121_v25, %v1082_v44  ;;  %v1826_v50 = vmul.f32 -1.442695, %v1126_v46 }
0x10cd   :  { %v1084_v41 = vpop.f32.mrf.mxu0  ;;  %v1974_v0 = vpop.f32.mrf.mxu1 }
0x10ce   :  { %v1827_v52 = vmul.f32 -1.442695, %v1152_v47  ;;  %2106 = vpow2.f32 %v1826_v50 }
0x10d0   :  { %2108 = vpow2.f32 %v1827_v52 }
0x10db   :  { %v2107_v53 = vpop.eup %2106 }
0x10dc   :  { %v1130_v54 = vadd.f32 1.0, %v2107_v53 }
0x10dd   :  { %v2109_v27 = vpop.eup %2108 }
0x10de   :  { %v1156_v55 = vadd.f32 1.0, %v2109_v27  ;;  %2110 = vrcp.f32 %v1130_v54 }
0x10e0   :  { %2112 = vrcp.f32 %v1156_v55 }
0x10eb   :  { %v2111_v57 = vpop.eup %2110 }
0x10ec   :  { %v1144_v19 = vsub.f32 1.0, %v2111_v57  ;;  %v1150_v56 = vmul.f32 %v2111_v57, %v2596_v30  ;;  %v2175_v30 = vld [vmem:[%s2921_s3 + $0x50] ss:$12 sps:$4 sm:$0xff]  }
0x10ed   :  { %v2113_v58 = vpop.eup %2112 }
0x10ee   :  { %v1170_v31 = vsub.f32 1.0, %v2113_v58  ;;  %v1176_v35 = vmul.f32 %v2113_v58, %v2601_v17 }
0x113c   :  { %v1161_v60 = vpop.permute.xlu0 %1160  ;;  %v1135_v59 = vpop.permute.xlu1 %1134 }
0x113d   :  { %v1163_v6 = vmul.f32 %v2113_v58, %v1161_v60  ;;  %v1137_v11 = vmul.f32 %v2111_v57, %v1135_v59 }
0x113f   :  { %1165 = vrot.lane.b32.xlu0 %v1163_v6, %s2182_s28  ;;  %1139 = vrot.lane.b32.xlu1 %v1137_v11, %s2182_s28 }
0x11b1   :  { %v1166_v28 = vpop.permute.xlu0 %1165  ;;  %v1140_v62 = vpop.permute.xlu1 %1139 }
0x11b2   :  { %v1168_v12 = vadd.f32 %v1166_v28, %v1082_v44  ;;  %v1142_v13 = vadd.f32 %v1140_v62, %v126_v45 }
0x11b4   :  { %2114 = vtanh.f32 %v1168_v12 }
0x11b5   :  { %2116 = vtanh.f32 %v1142_v13 }
0x11c1   :  { %v2115_v63 = vpop.eup %2114 }
0x11c2   :  { %v2117_v14 = vpop.eup %2116  ;;  %1172 = vrot.lane.b32.xlu0 %v2115_v63, %s2184_s20 }
0x11c3   :  { %1146 = vrot.lane.b32.xlu1 %v2117_v14, %s2184_s20 }
0x1234   :  { %v1173_v61 = vpop.permute.xlu0 %1172 }
0x1235   :  { %v1147_v22 = vpop.permute.xlu1 %1146  ;;  %v1175_v34 = vmul.f32 %v1173_v61, %v1170_v31 }
0x1236   :  { %v1149_v23 = vmul.f32 %v1147_v22, %v1144_v19 }
0x1237   :  { %v2675_v36 = vadd.f32 %v1176_v35, %v1175_v34 }
0x1238   :  { %v2670_v26 = vadd.f32 %v1150_v56, %v1149_v23 }
0x123a   :  { %1184 = vrot.lane.b32.xlu1 %v2670_v26, %s2184_s20 }
0x12ac   :  { %v1185_v38 = vpop.permute.xlu1 %1184 }
0x12ad   :  { %v1187_v39 = vsel %vm280_vm2, %v1185_v38, %v2675_v36 }
0x12ae   :  { %v1188_v4 = vpack.c.bf16 %v1187_v39, %v1187_v39 }
0x12b0   :  { %1828 = vmatmul.mubr.msk.bf16.vlgmr.msra.gmra.mxu0 %vm206_vm3, %v1188_v4  ;;  %1984 = vmatmul.mubr.msk.bf16.vlgmr.msra.gmra.mxu1 %vm206_vm3, %v1188_v4 }
0x12b1   :  { %1348 = vmatpush1.bf16.msra.mxu0 %v2610_v33  ;;  %1988 = vmatpush3.bf16.msra.mxu1 %v2175_v30  ;;  %v2176_v33 = vld [vmem:[%s2921_s3 + $0x38] ss:$12 sps:$4 sm:$0xff]  }
0x12b2   :  { %1349 = vmatprep.subr.bf16.mxu0 %v2617_v18  ;;  %1989 = vmatprep.subr.bf16.mxu1 %v2183_v43  ;;  %v2178_v18 = vld [vmem:[%s2921_s3] ss:$12 sps:$4 sm:$0xff]  }
0x12b3   :  { %1371 = vmatprep.mubr.bf16.mxu0 %v2180_v1  ;;  %1995 = vmatprep.mubr.msk.bf16.mxu1 %vm2185_vm1, %v2183_v43  ;;  %v2177_v1 = vld [vmem:[%s2921_s3 + $0x20] ss:$12 sps:$4 sm:$0xff]  }
0x12b5   :  { %1350 = vmatpush1.bf16.msra.mxu0 %v2627_v2  ;;  %1990 = vmatpush3.bf16.msra.mxu1 %v2176_v33 }
0x12b6   :  { %1351 = vmatprep.subr.bf16.mxu0 %v2634_v42  ;;  %1991 = vmatprep.subr.bf16.mxu1 %v2183_v43 }
0x12b9   :  { %1352 = vmatpush1.bf16.msra.mxu0 %v2641_v3  ;;  %1992 = vmatpush3.bf16.msra.mxu1 %v2177_v1 }
0x12ba   :  { %1353 = vmatprep.subr.bf16.mxu0 %v2648_v48  ;;  %1993 = vmatprep.subr.bf16.mxu1 %v2183_v43 }
0x12bd   :  { %1354 = vmatpush1.bf16.msra.mxu0 %v2178_v18  ;;  %1994 = vmatpush3.bf16.msra.mxu1 %v2368_v51  ;;  %v2179_v51 = vld [vmem:[%s2925_s2] ss:$0 sm:$0xff] }
0x1370   :  { %v1226_v2 = vpop.f32.mrf.mxu0  ;;  %v1267_v42 = vpop.f32.mrf.mxu1 }
0x1371   :  { %v1227_v3 = vadd.f32 %v1226_v2, %v2314_v21  ;;  %v1268_v49 = vadd.f32 %v1267_v42, %v2410_v10  ;;  %v129_v21 = vadd.f32 %v2179_v51, %v2407_v9 }
0x1372   :  { %v1228_v5 = vpop.f32.mrf.mxu0  ;;  %v1985_v7 = vpop.f32.mrf.mxu1 }
0x1373   :  { %1307 = vrot.lane.b32.xlu1 %v1268_v49, %s2182_s28  ;;  %1281 = vrot.lane.b32.xlu0 %v1227_v3, %s2182_s28  ;;  %v1229_v40 = vadd.f32 %v1228_v5, %v2420_v29  ;;  %v1273_v15 = vadd.f32 %v1227_v3, %v129_v21 }
0x1374   :  { %v1230_v43 = vpop.f32.mrf.mxu0  ;;  %v1270_v48 = vpop.f32.mrf.mxu1 }
0x1375   :  { %v1299_v20 = vadd.f32 %v1268_v49, %v1229_v40  ;;  %v1830_v41 = vmul.f32 -1.442695, %v1273_v15 }
0x1376   :  { %v1231_v25 = vpop.f32.mrf.mxu0  ;;  %v1986_v8 = vpop.f32.mrf.mxu1 }
0x1377   :  { %v1831_v0 = vmul.f32 -1.442695, %v1299_v20  ;;  %2118 = vpow2.f32 %v1830_v41 }
0x1379   :  { %2120 = vpow2.f32 %v1831_v0 }
0x1384   :  { %v2119_v44 = vpop.eup %2118 }
0x1385   :  { %v1277_v46 = vadd.f32 1.0, %v2119_v44 }
0x1386   :  { %v2121_v45 = vpop.eup %2120 }
0x1387   :  { %v1303_v47 = vadd.f32 1.0, %v2121_v45  ;;  %2122 = vrcp.f32 %v1277_v46 }
0x1389   :  { %2124 = vrcp.f32 %v1303_v47 }
0x1394   :  { %v2123_v50 = vpop.eup %2122 }
0x1395   :  { %v1291_v11 = vsub.f32 1.0, %v2123_v50  ;;  %v1297_v62 = vmul.f32 %v2123_v50, %v2670_v26 }
0x1396   :  { %v2125_v52 = vpop.eup %2124 }
0x1397   :  { %v1317_v14 = vsub.f32 1.0, %v2125_v52  ;;  %v1323_v22 = vmul.f32 %v2125_v52, %v2675_v36 }
0x13e5   :  { %v1308_v53 = vpop.permute.xlu1 %1307  ;;  %v1282_v27 = vpop.permute.xlu0 %1281 }
0x13e6   :  { %v1310_v54 = vmul.f32 %v2125_v52, %v1308_v53  ;;  %v1284_v55 = vmul.f32 %v2123_v50, %v1282_v27 }
0x13e8   :  { %1312 = vrot.lane.b32.xlu1 %v1310_v54, %s2182_s28  ;;  %1286 = vrot.lane.b32.xlu0 %v1284_v55, %s2182_s28 }
0x145a   :  { %v1313_v9 = vpop.permute.xlu1 %1312  ;;  %v1287_v57 = vpop.permute.xlu0 %1286 }
0x145b   :  { %v1315_v58 = vadd.f32 %v1313_v9, %v1229_v40  ;;  %v1289_v60 = vadd.f32 %v1287_v57, %v129_v21  ;;  %v2039_v40 = vld [vmem:[%s2926_s5] sm:$0xff]  }
0x145d   :  { %2126 = vtanh.f32 %v1315_v58 }
0x145e   :  { %2128 = vtanh.f32 %v1289_v60  ;;  %v1835_v60 = vld [vmem:[%s2927_s6] ss:$0 sm:$0xff]  ;;  %s2187_s6 = smov 120  }
0x146a   :  { %v2127_v59 = vpop.eup %2126 }
0x146b   :  { %v2129_v6 = vpop.eup %2128  ;;  %1319 = vrot.lane.b32.xlu1 %v2127_v59, %s2184_s20 }
0x146c   :  { %1293 = vrot.lane.b32.xlu0 %v2129_v6, %s2184_s20 }
0x14dd   :  { %v1320_v63 = vpop.permute.xlu1 %1319 }
0x14de   :  { %v1294_v28 = vpop.permute.xlu0 %1293  ;;  %v1322_v19 = vmul.f32 %v1320_v63, %v1317_v14 }
0x14df   :  { %v1296_v12 = vmul.f32 %v1294_v28, %v1291_v11 }
0x14e0   :  { %v1324_v56 = vadd.f32 %v1323_v22, %v1322_v19 }
0x14e1   :  { %v1298_v13 = vadd.f32 %v1297_v62, %v1296_v12 }
0x14e3   :  { %1331 = vrot.lane.b32.xlu0 %v1298_v13, %s2184_s20 }
0x1555   :  { %v1332_v23 = vpop.permute.xlu0 %1331 }
0x1556   :  { %v1334_v61 = vsel %vm280_vm2, %v1332_v23, %v1324_v56 }
0x1557   :  { %v1335_v31 = vpack.c.bf16 %v1334_v61, %v1334_v61 }
0x1559   :  { %1832 = vmatmul.mubr.msk.bf16.vlgmr.msra.gmra.mxu0 %vm206_vm3, %v1335_v31  ;;  %1996 = vmatmul.mubr.msk.bf16.vlgmr.msra.gmra.mxu1 %vm206_vm3, %v1335_v31 }
0x1619   :  { %v1373_v34 = vpop.f32.mrf.mxu0  ;;  %v1413_v26 = vpop.f32.mrf.mxu1 }
0x161a   :  { %v1414_v35 = vadd.f32 %v1413_v26, %v2410_v10 }
0x161b   :  { %v1374_v38 = vpop.f32.mrf.mxu0  ;;  %v1997_v39 = vpop.f32.mrf.mxu1 }
0x161c   :  { %1427 = vrot.lane.b32.xlu1 %v1414_v35, %s2182_s28  ;;  %v1375_v18 = vadd.f32 %v1374_v38, %v2420_v29 }
0x161d   :  { %v1376_v4 = vpop.f32.mrf.mxu0  ;;  %v1416_v30 = vpop.f32.mrf.mxu1 }
0x161e   :  { %v1419_v2 = vadd.f32 %v1414_v35, %v1375_v18 }
0x161f   :  { %v1377_v33 = vpop.f32.mrf.mxu0  ;;  %v1998_v1 = vpop.f32.mrf.mxu1 }
0x1620   :  { %v1834_v42 = vmul.f32 -1.442695, %v1419_v2 }
0x1622   :  { %2130 = vpow2.f32 %v1834_v42 }
0x162f   :  { %v2131_v3 = vpop.eup %2130 }
0x1630   :  { %v1423_v49 = vadd.f32 1.0, %v2131_v3 }
0x1632   :  { %2132 = vrcp.f32 %v1423_v49 }
0x163f   :  { %v2133_v5 = vpop.eup %2132 }
0x1640   :  { %v1437_v51 = vsub.f32 1.0, %v2133_v5  ;;  %v1443_v15 = vmul.f32 %v2133_v5, %v1324_v56 }
0x168e   :  { %v1428_v7 = vpop.permute.xlu1 %1427 }
0x168f   :  { %v1430_v43 = vmul.f32 %v2133_v5, %v1428_v7 }
0x1691   :  { %1432 = vrot.lane.b32.xlu0 %v1430_v43, %s2182_s28 }
0x1695   :  { %444 = vrot.lane.b32.xlu0 %v2433_v16, %s2184_s20  ;;  %v2038_v16 = vld [vmem:[%s2926_s5 + $0x8] sm:$0xff]  }
0x1696   :  { %1999 = vmatprep.subr.bf16.mxu0 %v2038_v16 }
0x1697   :  { %2000 = vmatpush3.bf16.msra.mxu0 %v2038_v16 }
0x1698   :  { %2001 = vmatprep.subr.bf16.mxu0 %v2039_v40 }
0x1699   :  { %738 = vrot.lane.b32.xlu0 %v2517_v32, %s2184_s20 }
0x169b   :  { %2002 = vmatpush3.bf16.msra.mxu0 %v2039_v40 }
0x169d   :  { %1032 = vrot.lane.b32.xlu0 %v2601_v17, %s2184_s20 }
0x16a1   :  { %1326 = vrot.lane.b32.xlu0 %v1324_v56, %s2184_s20 }
0x1703   :  { %v1433_v10 = vpop.permute.xlu0 %1432 }
0x1704   :  { %v1435_v29 = vadd.f32 %v1433_v10, %v1375_v18 }
0x1706   :  { %2134 = vtanh.f32 %v1435_v29 }
0x1707   :  { %v445_v48 = vpop.permute.xlu0 %444 }
0x1708   :  { %447 = vst.msk [vmem:[#allocation2] sm:$0xff] %vm280_vm2, %v445_v48 }
0x170b   :  { %v739_v25 = vpop.permute.xlu0 %738 }
0x170c   :  { %741 = vst.msk [vmem:[#allocation2 + $0x10] sm:$0xff] %vm280_vm2, %v739_v25 }
0x170f   :  { %v1033_v8 = vpop.permute.xlu0 %1032  ;;  %v1450_v45 = vld [vmem:[#allocation2] sm:$0xff] }
0x1710   :  { %1035 = vst.msk [vmem:[#allocation2 + $0x20] sm:$0xff] %vm280_vm2, %v1033_v8 }
0x1713   :  { %v2135_v32 = vpop.eup %2134  ;;  %v1327_v17 = vpop.permute.xlu0 %1326 }
0x1714   :  { %1329 = vst.msk [vmem:[#allocation2 + $0x30] sm:$0xff] %vm280_vm2, %v1327_v17  ;;  %1439 = vrot.lane.b32.xlu1 %v2135_v32, %s2184_s20 }
0x1717   :  { %v1454_v52 = vld [vmem:[#allocation2 + $0x20] sm:$0xff] }
0x1718   :  { %591 = vrot.lane.b32.xlu1 %v2475_v24, %s2184_s20 }
0x171b   :  { %v1456_v55 = vld [vmem:[#allocation2 + $0x30] sm:$0xff] }
0x171c   :  { %885 = vrot.lane.b32.xlu1 %v2559_v37, %s2184_s20 }
0x1720   :  { %1179 = vrot.lane.b32.xlu1 %v2675_v36, %s2184_s20  ;;  %v1452_v36 = vld [vmem:[#allocation2 + $0x10] sm:$0xff] }
0x1786   :  { %v1440_v21 = vpop.permute.xlu1 %1439 }
0x1787   :  { %v1442_v20 = vmul.f32 %v1440_v21, %v1437_v51 }
0x1789   :  { %v1444_v41 = vadd.f32 %v1443_v15, %v1442_v20 }
0x178a   :  { %v592_v0 = vpop.permute.xlu1 %591 }
0x178b   :  { %594 = vst.msk [vmem:[#allocation2 + $0x8] sm:$0xff] %vm280_vm2, %v592_v0  ;;  %1446 = vrot.lane.b32.xlu1 %v1444_v41, %s2184_s20 }
0x178e   :  { %v886_v44 = vpop.permute.xlu1 %885 }
0x178f   :  { %888 = vst.msk [vmem:[#allocation2 + $0x18] sm:$0xff] %vm280_vm2, %v886_v44 }
0x1792   :  { %v1180_v24 = vpop.permute.xlu1 %1179  ;;  %v1451_v46 = vld [vmem:[#allocation2 + $0x8] sm:$0xff] }
0x1793   :  { %1182 = vst.msk [vmem:[#allocation2 + $0x28] sm:$0xff] %vm280_vm2, %v1180_v24  ;;  %v1458_v37 = vpack.c.bf16 %v1451_v46, %v1450_v45 }
0x1795   :  { %2003 = vmatprep.mubr.msk.bf16.mxu0 %vm280_vm2, %v1458_v37 }
0x1796   :  { %v1453_v47 = vld [vmem:[#allocation2 + $0x18] sm:$0xff] }
0x1797   :  { %v1459_v50 = vpack.c.bf16 %v1453_v47, %v1452_v36 }
0x1799   :  { %2004 = vmatmul.mubr.msk.bf16.vlgmr.msra.gmra.mxu0 %vm280_vm2, %v1459_v50 }
0x179a   :  { %v1455_v53 = vld [vmem:[#allocation2 + $0x28] sm:$0xff] }
0x179b   :  { %v1460_v27 = vpack.c.bf16 %v1455_v53, %v1454_v52 }
0x179d   :  { %2007 = vmatprep.mubr.msk.bf16.mxu0 %vm280_vm2, %v1460_v27 }
0x17fd   :  { %v1447_v54 = vpop.permute.xlu1 %1446 }
0x17fe   :  { %1449 = vst.msk [vmem:[#allocation2 + $0x38] sm:$0xff] %vm280_vm2, %v1447_v54 }
0x1805   :  { %v1457_v9 = vld [vmem:[#allocation2 + $0x38] sm:$0xff] }
0x1806   :  { %v1461_v57 = vpack.c.bf16 %v1457_v9, %v1456_v55 }
0x1808   :  { %2008 = vmatmul.mubr.msk.bf16.gmra.mxu0 %vm280_vm2, %v1461_v57 }
0x1859   :  { %v2005_v58 = vpop.f32.mrf.mxu0 }
0x185a   :  { %v1540_v6 = vadd.f32 %v2005_v58, %v1835_v60 }
0x185b   :  { %v1531_v59 = vpop.f32.mrf.mxu0 }
0x185c   :  { %v1532_v11 = vadd.f32 %v1835_v60, %v1531_v59 }
0x185d   :  { %v2006_v28 = vpop.f32.mrf.mxu0 }
0x185e   :  { %2136 = vtanh.f32 %v1532_v11  ;;  %v1543_v12 = vadd.f32 %v2006_v28, %v1835_v60 }
0x185f   :  { %v1534_v62 = vpop.f32.mrf.mxu0  ;;  %2138 = vtanh.f32 %v1540_v6 }
0x1860   :  { %v1535_v13 = vadd.f32 %v1835_v60, %v1534_v62 }
0x1862   :  { %2140 = vtanh.f32 %v1535_v13 }
0x1863   :  { %2142 = vtanh.f32 %v1543_v12 }
0x186b   :  { %v2765_v63 = vpop.eup %2136 }
0x186c   :  { %v1570_v14 = vmul.f32 %v2765_v63, %v2765_v63  ;;  %v2769_v19 = vpop.eup %2138 }
0x186d   :  { %v1572_v23 = vmul.f32 %v2769_v19, %v2769_v19 }
0x186e   :  { %1586 = vrot.lane.b32.xlu0 %v1570_v14, %s2186_s23 }
0x186f   :  { %v2772_v22 = vpop.eup %2140 }
0x1870   :  { %v1571_v56 = vmul.f32 %v2772_v22, %v2772_v22  ;;  %v2778_v61 = vpop.eup %2142 }
0x1871   :  { %v1573_v31 = vmul.f32 %v2778_v61, %v2778_v61 }
0x1872   :  { %1588 = vrot.lane.b32.xlu1 %v1571_v56, %s2186_s23  ;;  %1590 = vrot.lane.b32.xlu0 %v1572_v23, %s2186_s23 }
0x1876   :  { %1592 = vrot.lane.b32.xlu1 %v1573_v31, %s2186_s23  ;;  %1618 = vrot.lane.b32.xlu0 %v1570_v14, %s2187_s6 }
0x187a   :  { %1620 = vrot.lane.b32.xlu1 %v1571_v56, %s2187_s6  ;;  %1622 = vrot.lane.b32.xlu0 %v1572_v23, %s2187_s6 }
0x187e   :  { %1624 = vrot.lane.b32.xlu1 %v1573_v31, %s2187_s6 }
0x18c8   :  { %v2009_v34 = vpop.f32.mrf.mxu0 }
0x18c9   :  { %v1556_v26 = vadd.f32 %v2009_v34, %v1835_v60 }
0x18ca   :  { %v1547_v35 = vpop.f32.mrf.mxu0 }
0x18cb   :  { %2144 = vtanh.f32 %v1556_v26  ;;  %v1548_v38 = vadd.f32 %v1835_v60, %v1547_v35 }
0x18cc   :  { %v2010_v39 = vpop.f32.mrf.mxu0 }
0x18cd   :  { %2146 = vtanh.f32 %v1548_v38  ;;  %v1559_v4 = vadd.f32 %v2010_v39, %v1835_v60 }
0x18ce   :  { %v1550_v30 = vpop.f32.mrf.mxu0 }
0x18cf   :  { %2148 = vtanh.f32 %v1559_v4  ;;  %v1551_v33 = vadd.f32 %v1835_v60, %v1550_v30 }
0x18d1   :  { %2150 = vtanh.f32 %v1551_v33 }
0x18d8   :  { %v2789_v1 = vpop.eup %2144 }
0x18d9   :  { %v1576_v18 = vmul.f32 %v2789_v1, %v2789_v1 }
0x18da   :  { %v2793_v2 = vpop.eup %2146 }
0x18db   :  { %1598 = vrot.lane.b32.xlu0 %v1576_v18, %s2186_s23  ;;  %v1574_v49 = vmul.f32 %v2793_v2, %v2793_v2 }
0x18dc   :  { %v2796_v42 = vpop.eup %2148 }
0x18dd   :  { %v1577_v3 = vmul.f32 %v2796_v42, %v2796_v42 }
0x18de   :  { %v2802_v5 = vpop.eup %2150 }
0x18df   :  { %1600 = vrot.lane.b32.xlu1 %v1577_v3, %s2186_s23  ;;  %1594 = vrot.lane.b32.xlu0 %v1574_v49, %s2186_s23  ;;  %v1575_v43 = vmul.f32 %v2802_v5, %v2802_v5 }
0x18e0   :  { %v1587_v7 = vpop.permute.xlu0 %1586 }
0x18e1   :  { %v1610_v48 = vadd.f32 %v1587_v7, %v1570_v14 }
0x18e3   :  { %1596 = vrot.lane.b32.xlu1 %v1575_v43, %s2186_s23  ;;  %1626 = vrot.lane.b32.xlu0 %v1574_v49, %s2187_s6 }
0x18e4   :  { %v1589_v10 = vpop.permute.xlu1 %1588  ;;  %v1591_v29 = vpop.permute.xlu0 %1590 }
0x18e5   :  { %v1611_v32 = vadd.f32 %v1589_v10, %v1571_v56  ;;  %v1612_v17 = vadd.f32 %v1591_v29, %v1572_v23 }
0x18e7   :  { %1628 = vrot.lane.b32.xlu1 %v1575_v43, %s2187_s6  ;;  %1630 = vrot.lane.b32.xlu0 %v1576_v18, %s2187_s6 }
0x18e8   :  { %v1593_v25 = vpop.permute.xlu1 %1592  ;;  %v1619_v8 = vpop.permute.xlu0 %1618 }
0x18e9   :  { %v1642_v16 = vadd.f32 %v1619_v8, %v1610_v48  ;;  %v1613_v41 = vadd.f32 %v1593_v25, %v1573_v31 }
0x18eb   :  { %v1650_v40 = vadd.f32 1e-12, %v1642_v16  ;;  %1632 = vrot.lane.b32.xlu1 %v1577_v3, %s2187_s6 }
0x18ec   :  { %v1621_v51 = vpop.permute.xlu1 %1620  ;;  %v1623_v21 = vpop.permute.xlu0 %1622 }
0x18ed   :  { %2152 = vrsqrt.f32 %v1650_v40  ;;  %v1643_v15 = vadd.f32 %v1621_v51, %v1611_v32  ;;  %v1644_v20 = vadd.f32 %v1623_v21, %v1612_v17 }
0x18ef   :  { %v1651_v0 = vadd.f32 1e-12, %v1643_v15  ;;  %v1652_v44 = vadd.f32 1e-12, %v1644_v20 }
0x18f0   :  { %v1625_v24 = vpop.permute.xlu1 %1624 }
0x18f1   :  { %2154 = vrsqrt.f32 %v1651_v0  ;;  %v1645_v45 = vadd.f32 %v1625_v24, %v1613_v41 }
0x18f2   :  { %2156 = vrsqrt.f32 %v1652_v44 }
0x18f3   :  { %v1653_v46 = vadd.f32 1e-12, %v1645_v45 }
0x18f5   :  { %2158 = vrsqrt.f32 %v1653_v46 }
0x18fa   :  { %v2153_v37 = vpop.eup %2152 }
0x18fb   :  { %1682 = vrot.lane.b32.xlu0 %v2153_v37, %s2188_s24 }
0x18fe   :  { %v2155_v36 = vpop.eup %2154 }
0x18ff   :  { %v2814_v47 = vpop.eup %2156  ;;  %1684 = vrot.lane.b32.xlu1 %v2155_v36, %s2188_s24  ;;  %v1667_v48 = vmul.f32 %v2155_v36, %v2772_v22 }
0x1900   :  { %1686 = vrot.lane.b32.xlu0 %v2814_v47, %s2188_s24  ;;  %v1668_v16 = vmul.f32 %v2814_v47, %v2769_v19 }
0x1902   :  { %v2819_v50 = vpop.eup %2158 }
0x1903   :  { %1688 = vrot.lane.b32.xlu1 %v2819_v50, %s2188_s24 }
0x1904   :  { %1714 = vrot.lane.b32.xlu0 %v2153_v37, %s2189_s25 }
0x1907   :  { %1716 = vrot.lane.b32.xlu1 %v2155_v36, %s2189_s25 }
0x1908   :  { %1718 = vrot.lane.b32.xlu0 %v2814_v47, %s2189_s25 }
0x190b   :  { %1720 = vrot.lane.b32.xlu1 %v2819_v50, %s2189_s25 }
0x194d   :  { %v1599_v52 = vpop.permute.xlu0 %1598 }
0x194e   :  { %v1616_v9 = vadd.f32 %v1599_v52, %v1576_v18 }
0x1951   :  { %v1601_v53 = vpop.permute.xlu1 %1600  ;;  %v1595_v27 = vpop.permute.xlu0 %1594 }
0x1952   :  { %v1614_v57 = vadd.f32 %v1595_v27, %v1574_v49  ;;  %v1617_v11 = vadd.f32 %v1601_v53, %v1577_v3  ;;  %v1666_v3 = vmul.f32 %v2153_v37, %v2765_v63 }
0x1955   :  { %v1597_v54 = vpop.permute.xlu1 %1596  ;;  %v1627_v55 = vpop.permute.xlu0 %1626 }
0x1956   :  { %v1646_v6 = vadd.f32 %v1627_v55, %v1614_v57  ;;  %v1615_v28 = vadd.f32 %v1597_v54, %v1575_v43 }
0x1958   :  { %v1654_v56 = vadd.f32 1e-12, %v1646_v6 }
0x1959   :  { %v1629_v58 = vpop.permute.xlu1 %1628  ;;  %v1631_v60 = vpop.permute.xlu0 %1630 }
0x195a   :  { %v1648_v59 = vadd.f32 %v1631_v60, %v1616_v9  ;;  %v1647_v13 = vadd.f32 %v1629_v58, %v1615_v28 }
0x195c   :  { %v1656_v62 = vadd.f32 1e-12, %v1648_v59  ;;  %v1655_v31 = vadd.f32 1e-12, %v1647_v13 }
0x195d   :  { %v1633_v12 = vpop.permute.xlu1 %1632 }
0x195e   :  { %v1649_v14 = vadd.f32 %v1633_v12, %v1617_v11  ;;  %2160 = vrsqrt.f32 %v1656_v62 }
0x1960   :  { %v1657_v23 = vadd.f32 1e-12, %v1649_v14 }
0x1962   :  { %2162 = vrsqrt.f32 %v1657_v23 }
0x1963   :  { %2164 = vrsqrt.f32 %v1654_v56 }
0x1964   :  { %2166 = vrsqrt.f32 %v1655_v31 }
0x196b   :  { %v2829_v34 = vpop.eup %2160 }
0x196c   :  { %1694 = vrot.lane.b32.xlu0 %v2829_v34, %s2188_s24  ;;  %v1672_v6 = vmul.f32 %v2829_v34, %v2789_v1 }
0x196d   :  { %v1683_v26 = vpop.permute.xlu0 %1682 }
0x196e   :  { %v1706_v33 = vmul.f32 %v2765_v63, %v1683_v26 }
0x196f   :  { %v2833_v35 = vpop.eup %2162 }
0x1970   :  { %v2165_v38 = vpop.eup %2164  ;;  %1696 = vrot.lane.b32.xlu1 %v2833_v35, %s2188_s24  ;;  %v1747_v10 = vsel %vm1746_vm4, %v1666_v3, %v1706_v33  ;;  %v1673_v23 = vmul.f32 %v2833_v35, %v2796_v42 }
0x1971   :  { %1690 = vrot.lane.b32.xlu0 %v2165_v38, %s2188_s24  ;;  %v1685_v39 = vpop.permute.xlu1 %1684  ;;  %v2167_v30 = vpop.eup %2166  ;;  %v1670_v53 = vmul.f32 %v2165_v38, %v2793_v2 }
0x1972   :  { %v1687_v4 = vpop.permute.xlu0 %1686  ;;  %v1707_v7 = vmul.f32 %v2772_v22, %v1685_v39  ;;  %v1671_v58 = vmul.f32 %v2167_v30, %v2802_v5 }
0x1973   :  { %v1708_v29 = vmul.f32 %v2769_v19, %v1687_v4 }
0x1974   :  { %1692 = vrot.lane.b32.xlu1 %v2167_v30, %s2188_s24  ;;  %v1748_v40 = vsel %vm1746_vm4, %v1667_v48, %v1707_v7 }
0x1975   :  { %1722 = vrot.lane.b32.xlu0 %v2165_v38, %s2189_s25  ;;  %v1689_v18 = vpop.permute.xlu1 %1688  ;;  %v1749_v15 = vsel %vm1746_vm4, %v1668_v16, %v1708_v29 }
0x1976   :  { %v1715_v49 = vpop.permute.xlu0 %1714  ;;  %v1709_v51 = vmul.f32 %v2778_v61, %v1689_v18 }
0x1977   :  { %v1738_v43 = vmul.f32 %v2765_v63, %v1715_v49 }
0x1978   :  { %1724 = vrot.lane.b32.xlu1 %v2167_v30, %s2189_s25 }
0x1979   :  { %v1756_v25 = vsel %vm1755_vm5, %v1747_v10, %v1738_v43  ;;  %1726 = vrot.lane.b32.xlu0 %v2829_v34, %s2189_s25  ;;  %v1717_v8 = vpop.permute.xlu1 %1716 }
0x197a   :  { %v1765_v32 = vsel %vm1764_vm6, %v1756_v25, 0.0  ;;  %v1739_v63 = vmul.f32 %v2772_v22, %v1717_v8  ;;  %v1719_v17 = vpop.permute.xlu0 %1718  ;;  %v1669_v22 = vmul.f32 %v2819_v50, %v2778_v61 }
0x197b   :  { %1773 = vst [vmem:[%s2928_s7] sm:$0xff] %v1765_v32  ;;  %v1740_v21 = vmul.f32 %v2769_v19, %v1719_v17 }
0x197c   :  { %v1757_v20 = vsel %vm1755_vm5, %v1748_v40, %v1739_v63  ;;  %1728 = vrot.lane.b32.xlu1 %v2833_v35, %s2189_s25  ;;  %v1750_v45 = vsel %vm1746_vm4, %v1669_v22, %v1709_v51 }
0x197d   :  { %v1766_v41 = vsel %vm1764_vm6, %v1757_v20, 0.0  ;;  %v1758_v0 = vsel %vm1755_vm5, %v1749_v15, %v1740_v21  ;;  %v1721_v44 = vpop.permute.xlu1 %1720 }
0x197e   :  { %1774 = vst [vmem:[%s2928_s7 + $0x8] sm:$0xff] %v1766_v41  ;;  %v1767_v19 = vsel %vm1764_vm6, %v1758_v0, 0.0  ;;  %v1741_v24 = vmul.f32 %v2778_v61, %v1721_v44 }
0x197f   :  { %1775 = vst [vmem:[%s2928_s7 + $0x10] sm:$0xff] %v1767_v19 }
0x1980   :  { %v1759_v46 = vsel %vm1755_vm5, %v1750_v45, %v1741_v24 }
0x1981   :  { %v1768_v37 = vsel %vm1764_vm6, %v1759_v46, 0.0 }
0x1982   :  { %1776 = vst [vmem:[%s2928_s7 + $0x18] sm:$0xff] %v1768_v37 }
0x19de   :  { %v1695_v36 = vpop.permute.xlu0 %1694 }
0x19df   :  { %v1712_v9 = vmul.f32 %v2789_v1, %v1695_v36 }
0x19e1   :  { %v1753_v14 = vsel %vm1746_vm4, %v1672_v6, %v1712_v9 }
0x19e2   :  { %v1697_v47 = vpop.permute.xlu1 %1696 }
0x19e3   :  { %v1691_v50 = vpop.permute.xlu0 %1690  ;;  %v1713_v12 = vmul.f32 %v2796_v42, %v1697_v47 }
0x19e4   :  { %v1710_v52 = vmul.f32 %v2793_v2, %v1691_v50 }
0x19e5   :  { %v1754_v38 = vsel %vm1746_vm4, %v1673_v23, %v1713_v12 }
0x19e6   :  { %v1693_v61 = vpop.permute.xlu1 %1692  ;;  %v1751_v57 = vsel %vm1746_vm4, %v1670_v53, %v1710_v52 }
0x19e7   :  { %v1723_v27 = vpop.permute.xlu0 %1722  ;;  %v1711_v54 = vmul.f32 %v2802_v5, %v1693_v61 }
0x19e8   :  { %v1742_v55 = vmul.f32 %v2793_v2, %v1723_v27 }
0x19e9   :  { %v1752_v2 = vsel %vm1746_vm4, %v1671_v58, %v1711_v54 }
0x19ea   :  { %v1760_v60 = vsel %vm1755_vm5, %v1751_v57, %v1742_v55  ;;  %v1725_v59 = vpop.permute.xlu1 %1724 }
0x19eb   :  { %v1769_v11 = vsel %vm1764_vm6, %v1760_v60, 0.0  ;;  %v1743_v28 = vmul.f32 %v2802_v5, %v1725_v59  ;;  %v1727_v62 = vpop.permute.xlu0 %1726 }
0x19ec   :  { %1777 = vst [vmem:[%s2928_s7 + $0x20] sm:$0xff] %v1769_v11  ;;  %v1744_v13 = vmul.f32 %v2789_v1, %v1727_v62 }
0x19ed   :  { %v1761_v56 = vsel %vm1755_vm5, %v1752_v2, %v1743_v28 }
0x19ee   :  { %v1770_v5 = vsel %vm1764_vm6, %v1761_v56, 0.0  ;;  %v1762_v31 = vsel %vm1755_vm5, %v1753_v14, %v1744_v13  ;;  %v1729_v34 = vpop.permute.xlu1 %1728 }
0x19ef   :  { %1778 = vst [vmem:[%s2928_s7 + $0x28] sm:$0xff] %v1770_v5  ;;  %v1771_v26 = vsel %vm1764_vm6, %v1762_v31, 0.0  ;;  %v1745_v1 = vmul.f32 %v2796_v42, %v1729_v34 }
0x19f0   :  { %1779 = vst [vmem:[%s2928_s7 + $0x30] sm:$0xff] %v1771_v26 }
0x19f1   :  { %v1763_v35 = vsel %vm1755_vm5, %v1754_v38, %v1745_v1 }
0x19f2   :  { %v1772_v39 = vsel %vm1764_vm6, %v1763_v35, 0.0 }
0x19f3   :  { %1780 = vst [vmem:[%s2928_s7 + $0x38] sm:$0xff] %v1772_v39 }

</bundles_post_ra>
